<compile_context>
chip_gen: v5e
topology: v5e:2x2
jax: 0.10.0
libtpu: 0.0.40
codegen_flags: <defaults>
</compile_context>

<pallas_src>
import functools

import numpy as np
import jax
import jax.numpy as jnp
from jax import lax
from jax.experimental import pallas as pl
from jax.experimental.pallas import tpu as pltpu

_EPS = 1e-5          # PyTorch BatchNorm2d default eps
_LANES = 128
_SUB = 8


def _pair(v):
    return (v, v) if isinstance(v, int) else tuple(v)


def _round_up(v, m):
    return -(-v // m) * m


# ---------------------------------------------------------------------------
# Static (trace-time) geometry planning
# ---------------------------------------------------------------------------
def _plan_layers(x_shape, params, strides, paddings):
    N, Cin, H, W = x_shape
    L = len(params)
    cfgs = []
    for k, p in enumerate(params):
        Cout, _cin_w, KH, KW = p["conv_w"].shape
        sh, sw = _pair(strides[k])
        ph, pw = _pair(paddings[k])
        if (sh, sw) != (1, 1):
            raise NotImplementedError(
                "fused Pallas FeatureEncoder: only stride=(1,1) is supported")
        OH = H + 2 * ph - KH + 1
        OW = W + 2 * pw - KW + 1
        last = (k == L - 1)
        CP = _LANES if last else _round_up(Cout, _SUB)   # lane-dense only for HBM out
        if k == 0:
            # layer 0: host-side im2col, single matmul with K = KH*KW*Cin
            pitch = _round_up(OW, _SUB)
            cfg = dict(kind="im2col", Cin=Cin, Cout=Cout, KH=KH, KW=KW,
                       ph=ph, pw=pw, OH=OH, OW=OW, pitch=pitch, M=OH * pitch,
                       K=_round_up(KH * KW * Cin, _SUB), CP=CP, last=last)
        else:
            # layer k>0: shifted-tap matmuls on the padded slab built in VMEM
            Hpad, Wpad = H + 2 * ph, W + 2 * pw
            Ws = _round_up(Wpad, _SUB)
            Hs = Hpad + 1                                # +1 guard row
            cfg = dict(kind="taps", Cin=Cin, Cout=Cout, KH=KH, KW=KW,
                       ph=ph, pw=pw, OH=OH, OW=OW,
                       Ws=Ws, Hs=Hs, R=Hs * Ws, pitch=Ws, M=OH * Ws,
                       K=cfgs[k - 1]["CP"],              # real prev channels only
                       CP=CP, last=last)
        if not last:
            assert OH >= 2 and OW >= 2, "maxpool(2,2) needs spatial dims >= 2"
            cfg["PH"], cfg["PW"] = OH // 2, OW // 2      # floor, like PyTorch
            H, W = cfg["PH"], cfg["PW"]
        Cin = Cout
        cfgs.append(cfg)
    return cfgs


def _build_sel(ck, cn):
    """0/1 selection matrices (even/odd source column) that map the row-pair-
    maxed layer-k slab straight into layer k+1's zero-padded input slab."""
    PH, PW, pitch = ck["PH"], ck["PW"], ck["pitch"]
    Mh = ck["M"] - pitch
    R, Ws, ph, pw = cn["R"], cn["Ws"], cn["ph"], cn["pw"]
    sel = np.zeros((2, R, Mh), np.float32)
    for h in range(PH):
        for w in range(PW):
            r = (h + ph) * Ws + (w + pw)          # destination row in next slab
            m = (2 * h) * pitch + 2 * w           # top-left of the 2x2 window
            sel[0, r, m] = 1.0
            sel[1, r, m + 1] = 1.0
    return jnp.asarray(sel, jnp.float32)


# ---------------------------------------------------------------------------
# Fused encoder kernel (closure over the static per-layer geometry)
# ---------------------------------------------------------------------------
def _make_encoder_kernel(cfgs):
    L = len(cfgs)
    n_trans = L - 1

    def kernel(*refs):
        idx = 0
        x_ref = refs[idx]; idx += 1
        layer_refs = []
        for _ in range(L):
            layer_refs.append(refs[idx:idx + 3]); idx += 3    # (w, scale, shift)
        sel_refs = refs[idx:idx + n_trans]; idx += n_trans
        out_ref = refs[idx]; idx += 1
        scratch = refs[idx:]
        slab_refs = scratch[:n_trans]                         # next-layer slabs
        acc_refs = scratch[n_trans:]                          # f32 accumulators

        src_ref = None
        for k, c in enumerate(cfgs):
            w_ref, sc_ref, sh_ref = layer_refs[k]

            if c["kind"] == "im2col":
                # ---- layer 0: ONE matmul, taps folded into the K dim --------
                acc = jnp.dot(x_ref[0], w_ref[...],
                              preferred_element_type=jnp.float32)    # (M, CP)
            else:
                # ---- layer k>0: KH*KW shifted-tap matmuls, K = real channels,
                #      accumulated into an f32 VMEM scratch (spill-free) -------
                acc_ref = acc_refs[k - 1]
                Ws, M = c["Ws"], c["M"]
                t = 0
                for i in range(c["KH"]):
                    for j in range(c["KW"]):
                        off = i * Ws + j
                        part = jnp.dot(src_ref[off:off + M, :], w_ref[t],
                                       preferred_element_type=jnp.float32)
                        if t == 0:
                            acc_ref[...] = part
                        else:
                            acc_ref[...] += part
                        t += 1
                acc = acc_ref[...]

            # ---- BatchNorm(eval) scale/shift in f32, then ReLU ---------------
            y = jnp.maximum(acc * sc_ref[...] + sh_ref[...], 0.0)    # (M, CP)

            if c["last"]:
                out_ref[0] = y.astype(out_ref.dtype)                 # lane-dense
            else:
                # ---- fused MaxPool2d(2,2) + next-layer slab build ------------
                pitch, M = c["pitch"], c["M"]
                # full-slab row-pair max; both slices sublane-aligned
                h1 = jnp.maximum(y[:M - pitch, :], y[pitch:, :])
                # batched selection matmuls: even / odd source column, pad ring
                # already encoded as all-zero rows -> zeroes in the slab
                pe = jnp.dot(sel_refs[k][0], h1,
                             preferred_element_type=jnp.float32)
                po = jnp.dot(sel_refs[k][1], h1,
                             preferred_element_type=jnp.float32)
                slab_ref = slab_refs[k]
                slab_ref[...] = jnp.maximum(pe, po)      # single aligned store
                src_ref = slab_ref

    return kernel


# ---------------------------------------------------------------------------
# Public forward (eval mode)
# ---------------------------------------------------------------------------
def feature_encoder_forward(x_nchw, params, strides, paddings):
    """FeatureEncoder forward (NCHW in / NCHW out), single fused Pallas call."""
    N, Cin0, H0, W0 = x_nchw.shape
    cfgs = _plan_layers(x_nchw.shape, params, strides, paddings)
    L = len(cfgs)
    c0, cl = cfgs[0], cfgs[-1]

    # ---- layer-0 host-side im2col-lite slab: (N, OH*pitch, KH*KW*Cin) bf16 --
    x = jnp.transpose(x_nchw, (0, 2, 3, 1)).astype(jnp.float32)      # -> NHWC
    xp = jnp.pad(x, ((0, 0), (c0["ph"], c0["ph"]), (c0["pw"], c0["pw"]), (0, 0)))
    taps = []
    for i in range(c0["KH"]):
        for j in range(c0["KW"]):
            taps.append(xp[:, i:i + c0["OH"], j:j + c0["OW"], :])
    patches = jnp.concatenate(taps, axis=-1)       # (N, OH, OW, KH*KW*Cin)
    patches = jnp.pad(
        patches,
        ((0, 0), (0, 0),
         (0, c0["pitch"] - c0["OW"]),
         (0, c0["K"] - c0["KH"] * c0["KW"] * c0["Cin"])))
    x_slab = patches.reshape(N, c0["M"], c0["K"]).astype(jnp.bfloat16)

    inputs = [x_slab]
    in_specs = [pl.BlockSpec((1, c0["M"], c0["K"]), lambda n: (n, 0, 0))]

    for c, p in zip(cfgs, params):
        Cout, Cin, KH, KW = p["conv_w"].shape
        if c["kind"] == "im2col":
            w = jnp.transpose(p["conv_w"], (2, 3, 1, 0)).reshape(KH * KW * Cin, Cout)
            w = jnp.pad(w, ((0, c["K"] - KH * KW * Cin), (0, c["CP"] - Cout)))
            w = w.astype(jnp.bfloat16)
            w_spec = pl.BlockSpec((c["K"], c["CP"]), lambda n: (0, 0))
        else:
            w = jnp.transpose(p["conv_w"], (2, 3, 1, 0)).reshape(KH * KW, Cin, Cout)
            w = jnp.pad(w, ((0, 0), (0, c["K"] - Cin), (0, c["CP"] - Cout)))
            w = w.astype(jnp.float32)              # tiny; keeps inner layers f32
            w_spec = pl.BlockSpec((KH * KW, c["K"], c["CP"]), lambda n: (0, 0, 0))
        # BN(eval) scale/shift applied in the f32 epilogue (not folded into w)
        scale = p["bn_gamma"] / jnp.sqrt(p["bn_var"] + _EPS)
        shift = (p["conv_b"] - p["bn_mean"]) * scale + p["bn_beta"]
        scale = jnp.pad(scale, (0, c["CP"] - Cout)).reshape(1, c["CP"]).astype(jnp.float32)
        shift = jnp.pad(shift, (0, c["CP"] - Cout)).reshape(1, c["CP"]).astype(jnp.float32)
        inputs += [w, scale, shift]
        in_specs += [w_spec,
                     pl.BlockSpec((1, c["CP"]), lambda n: (0, 0)),
                     pl.BlockSpec((1, c["CP"]), lambda n: (0, 0))]

    for k in range(L - 1):
        sel = _build_sel(cfgs[k], cfgs[k + 1])
        inputs.append(sel)
        in_specs.append(pl.BlockSpec(sel.shape, lambda n: (0, 0, 0)))

    out_shape = jax.ShapeDtypeStruct((N, cl["M"], cl["CP"]), jnp.bfloat16)
    out_specs = pl.BlockSpec((1, cl["M"], cl["CP"]), lambda n: (n, 0, 0))

    scratch_shapes = (
        [pltpu.VMEM((cfgs[k + 1]["R"], cfgs[k]["CP"]), jnp.float32)
         for k in range(L - 1)] +
        [pltpu.VMEM((cfgs[k]["M"], cfgs[k]["CP"]), jnp.float32)
         for k in range(1, L)])

    out = pl.pallas_call(
        _make_encoder_kernel(cfgs),
        grid=(N,),
        in_specs=in_specs,
        out_specs=out_specs,
        out_shape=out_shape,
        scratch_shapes=scratch_shapes,
        compiler_params=pltpu.CompilerParams(
            dimension_semantics=("parallel",),       # megacore split (v7x)
            vmem_limit_bytes=32 * 1024 * 1024),
    )(*inputs)

    # strip width-alignment / channel padding; back to NCHW (PyTorch layout)
    out = out.reshape(N, cl["OH"], cl["pitch"], cl["CP"])
    out = out[:, :, :cl["OW"], :cl["Cout"]].astype(jnp.float32)
    return jnp.transpose(out, (0, 3, 1, 2))


# ---------------------------------------------------------------------------
# Parameter init + pure-JAX reference (eval mode) for a correctness check
# ---------------------------------------------------------------------------
def init_params(key, input_channels, hidden_channels, kernel_sizes):
    params = []
    cin = input_channels
    for cout, k in zip(hidden_channels, kernel_sizes):
        kh, kw = _pair(k)
        key, k1, k2, k3, k4, k5, k6 = jax.random.split(key, 7)
        fan_in = cin * kh * kw
        params.append({
            "conv_w": jax.random.normal(k1, (cout, cin, kh, kw), jnp.float32)
                      * (1.0 / jnp.sqrt(fan_in)),
            "conv_b": jax.random.normal(k2, (cout,), jnp.float32) * 0.1,
            "bn_gamma": 1.0 + 0.1 * jax.random.normal(k3, (cout,), jnp.float32),
            "bn_beta": 0.1 * jax.random.normal(k4, (cout,), jnp.float32),
            "bn_mean": 0.1 * jax.random.normal(k5, (cout,), jnp.float32),
            "bn_var": jnp.abs(jax.random.normal(k6, (cout,), jnp.float32)) + 0.5,
        })
        cin = cout
    return params


def _reference_forward(x_nchw, params, strides, paddings):
    """Pure-JAX (XLA) eval-mode reference of the PyTorch FeatureEncoder."""
    x = x_nchw.astype(jnp.float32)
    L = len(params)
    for i, p in enumerate(params):
        sh, sw = _pair(strides[i])
        ph, pw = _pair(paddings[i])
        x = lax.conv_general_dilated(
            x, p["conv_w"], window_strides=(sh, sw),
            padding=((ph, ph), (pw, pw)),
            dimension_numbers=("NCHW", "OIHW", "NCHW"),
            precision=lax.Precision.HIGHEST)
        x = x + p["conv_b"][None, :, None, None]
        scale = p["bn_gamma"] / jnp.sqrt(p["bn_var"] + _EPS)
        x = (x - p["bn_mean"][None, :, None, None]) * scale[None, :, None, None]
        x = x + p["bn_beta"][None, :, None, None]
        x = jnp.maximum(x, 0.0)
        if i < L - 1:
            x = lax.reduce_window(x, -jnp.inf, lax.max,
                                  (1, 1, 2, 2), (1, 1, 2, 2), "VALID")
        # Dropout in eval mode is the identity.
    return x


if __name__ == "__main__":
    # FeatureEncoder(input_channels=4, hidden_channels=[8, 16],
    #                kernel_sizes=[3, 3], strides=[1, 1], paddings=[1, 1])
    input_channels = 4
    hidden_channels = [8, 16]
    kernel_sizes = [3, 3]
    strides = [1, 1]
    paddings = [1, 1]

    key = jax.random.PRNGKey(0)
    key, xkey = jax.random.split(key)
    x = jax.random.normal(xkey, (2, 4, 16, 16), jnp.float32)   # NCHW input

    params = init_params(key, input_channels, hidden_channels, kernel_sizes)

    fwd = jax.jit(functools.partial(feature_encoder_forward,
                                    strides=strides, paddings=paddings))
    out = jax.block_until_ready(fwd(x, params))

    # layer0: (2,8,16,16) -> pool -> (2,8,8,8); layer1: (2,16,8,8)
    assert out.shape == (2, 16, 8, 8), out.shape
    assert out.dtype == jnp.float32

    # correctness vs. f32 XLA reference (kernel uses bf16 layer-0 operands)
    ref = _reference_forward(x, params, strides, paddings)
    assert bool(jnp.allclose(out, ref, atol=1e-1, rtol=1e-1)), (
        float(jnp.max(jnp.abs(out - ref))))

    print("KERNEL_OK")
</pallas_src>

<mosaic_0001>
module attributes {stable_mosaic.version = 11 : i64} {
  func.func @kernel(%arg0: i32, %arg1: memref<1x256x40xbf16, #tpu.memory_space<vmem>>, %arg2: memref<40x8xbf16, #tpu.memory_space<vmem>>, %arg3: memref<1x8xf32, #tpu.memory_space<vmem>>, %arg4: memref<1x8xf32, #tpu.memory_space<vmem>>, %arg5: memref<9x8x128xf32, #tpu.memory_space<vmem>>, %arg6: memref<1x128xf32, #tpu.memory_space<vmem>>, %arg7: memref<1x128xf32, #tpu.memory_space<vmem>>, %arg8: memref<2x176x240xf32, #tpu.memory_space<vmem>>, %arg9: memref<1x128x128xbf16, #tpu.memory_space<vmem>>, %arg10: memref<176x8xf32, #tpu.memory_space<vmem>>, %arg11: memref<128x128xf32, #tpu.memory_space<vmem>>) attributes {dimension_semantics = [#tpu.dimension_semantics<parallel>], iteration_bounds = array<i64: 2>, scalar_prefetch = 0 : i64, scratch_operands = 2 : i64, tpu.core_type = #tpu.core_type<tc>, window_params = [{transform_indices = @transform_0, window_bounds = array<i64: 1, 256, 40>}, {pipeline_mode = #tpu.pipeline_mode<synchronous>, transform_indices = @transform_1, window_bounds = array<i64: 40, 8>}, {pipeline_mode = #tpu.pipeline_mode<synchronous>, transform_indices = @transform_2, window_bounds = array<i64: 1, 8>}, {pipeline_mode = #tpu.pipeline_mode<synchronous>, transform_indices = @transform_3, window_bounds = array<i64: 1, 8>}, {pipeline_mode = #tpu.pipeline_mode<synchronous>, transform_indices = @transform_4, window_bounds = array<i64: 9, 8, 128>}, {pipeline_mode = #tpu.pipeline_mode<synchronous>, transform_indices = @transform_5, window_bounds = array<i64: 1, 128>}, {pipeline_mode = #tpu.pipeline_mode<synchronous>, transform_indices = @transform_6, window_bounds = array<i64: 1, 128>}, {pipeline_mode = #tpu.pipeline_mode<synchronous>, transform_indices = @transform_7, window_bounds = array<i64: 2, 176, 240>}, {transform_indices = @transform_8, window_bounds = array<i64: 1, 128, 128>}]} {
    %c0 = arith.constant 0 : index
    %c0_0 = arith.constant 0 : index
    %c0_1 = arith.constant 0 : index
    %0 = vector.load %arg1[%c0, %c0_0, %c0_1] : memref<1x256x40xbf16, #tpu.memory_space<vmem>>, vector<1x256x40xbf16>
    %1 = vector.shape_cast %0 : vector<1x256x40xbf16> to vector<256x40xbf16>
    %c0_2 = arith.constant 0 : index
    %c0_3 = arith.constant 0 : index
    %2 = vector.load %arg2[%c0_2, %c0_3] : memref<40x8xbf16, #tpu.memory_space<vmem>>, vector<40x8xbf16>
    %cst = arith.constant dense<0.000000e+00> : vector<256x8xf32>
    %3 = tpu.matmul %1, %2, %cst {dimension_numbers = #tpu.dot_dimension_numbers<[1], [0], [0], [1], [0, 0, 1, 1], [], []>} : vector<256x40xbf16>, vector<40x8xbf16>, vector<256x8xf32> -> vector<256x8xf32>
    %c0_4 = arith.constant 0 : index
    %c0_5 = arith.constant 0 : index
    %4 = vector.load %arg3[%c0_4, %c0_5] : memref<1x8xf32, #tpu.memory_space<vmem>>, vector<1x8xf32>
    %5 = vector.broadcast %4 : vector<1x8xf32> to vector<256x8xf32>
    %6 = arith.mulf %3, %5 : vector<256x8xf32>
    %c0_6 = arith.constant 0 : index
    %c0_7 = arith.constant 0 : index
    %7 = vector.load %arg4[%c0_6, %c0_7] : memref<1x8xf32, #tpu.memory_space<vmem>>, vector<1x8xf32>
    %8 = vector.broadcast %7 : vector<1x8xf32> to vector<256x8xf32>
    %9 = arith.addf %6, %8 : vector<256x8xf32>
    %cst_8 = arith.constant 0.000000e+00 : f32
    %10 = vector.broadcast %cst_8 : f32 to vector<256x8xf32>
    %11 = arith.maximumf %9, %10 : vector<256x8xf32>
    %12 = vector.extract_strided_slice %11 {offsets = [0, 0], sizes = [240, 8], strides = [1, 1]} : vector<256x8xf32> to vector<240x8xf32>
    %13 = vector.extract_strided_slice %11 {offsets = [16, 0], sizes = [240, 8], strides = [1, 1]} : vector<256x8xf32> to vector<240x8xf32>
    %14 = arith.maximumf %12, %13 : vector<240x8xf32>
    %c0_9 = arith.constant 0 : index
    %c0_10 = arith.constant 0 : index
    %c0_11 = arith.constant 0 : index
    %15 = vector.load %arg8[%c0_9, %c0_10, %c0_11] : memref<2x176x240xf32, #tpu.memory_space<vmem>>, vector<1x176x240xf32>
    %16 = vector.shape_cast %15 : vector<1x176x240xf32> to vector<176x240xf32>
    %cst_12 = arith.constant dense<0.000000e+00> : vector<176x8xf32>
    %17 = tpu.matmul %16, %14, %cst_12 {dimension_numbers = #tpu.dot_dimension_numbers<[1], [0], [0], [1], [0, 0, 1, 1], [], []>} : vector<176x240xf32>, vector<240x8xf32>, vector<176x8xf32> -> vector<176x8xf32>
    %c1 = arith.constant 1 : index
    %c0_13 = arith.constant 0 : index
    %c0_14 = arith.constant 0 : index
    %18 = vector.load %arg8[%c1, %c0_13, %c0_14] : memref<2x176x240xf32, #tpu.memory_space<vmem>>, vector<1x176x240xf32>
    %19 = vector.shape_cast %18 : vector<1x176x240xf32> to vector<176x240xf32>
    %cst_15 = arith.constant dense<0.000000e+00> : vector<176x8xf32>
    %20 = tpu.matmul %19, %14, %cst_15 {dimension_numbers = #tpu.dot_dimension_numbers<[1], [0], [0], [1], [0, 0, 1, 1], [], []>} : vector<176x240xf32>, vector<240x8xf32>, vector<176x8xf32> -> vector<176x8xf32>
    %21 = arith.maximumf %17, %20 : vector<176x8xf32>
    %c0_16 = arith.constant 0 : index
    %c0_17 = arith.constant 0 : index
    %22 = vector.load %arg10[%c0_16, %c0_17] : memref<176x8xf32, #tpu.memory_space<vmem>>, vector<176x8xf32>
    tpu.vector_store %arg10[%c0_16, %c0_17], %21 {strides = array<i32>} : memref<176x8xf32, #tpu.memory_space<vmem>>, vector<176x8xf32>,
    %c0_18 = arith.constant 0 : index
    %c0_19 = arith.constant 0 : index
    %23 = vector.load %arg10[%c0_18, %c0_19] : memref<176x8xf32, #tpu.memory_space<vmem>>, vector<128x8xf32>
    %c0_20 = arith.constant 0 : index
    %c0_21 = arith.constant 0 : index
    %c0_22 = arith.constant 0 : index
    %24 = vector.load %arg5[%c0_20, %c0_21, %c0_22] : memref<9x8x128xf32, #tpu.memory_space<vmem>>, vector<1x8x128xf32>
    %25 = vector.shape_cast %24 : vector<1x8x128xf32> to vector<8x128xf32>
    %cst_23 = arith.constant dense<0.000000e+00> : vector<128x128xf32>
    %26 = tpu.matmul %23, %25, %cst_23 {dimension_numbers = #tpu.dot_dimension_numbers<[1], [0], [0], [1], [0, 0, 1, 1], [], []>} : vector<128x8xf32>, vector<8x128xf32>, vector<128x128xf32> -> vector<128x128xf32>
    %c0_24 = arith.constant 0 : index
    %c0_25 = arith.constant 0 : index
    %27 = vector.load %arg11[%c0_24, %c0_25] : memref<128x128xf32, #tpu.memory_space<vmem>>, vector<128x128xf32>
    tpu.vector_store %arg11[%c0_24, %c0_25], %26 {strides = array<i32>} : memref<128x128xf32, #tpu.memory_space<vmem>>, vector<128x128xf32>,
    %c1_26 = arith.constant 1 : index
    %c0_27 = arith.constant 0 : index
    %28 = vector.load %arg10[%c1_26, %c0_27] : memref<176x8xf32, #tpu.memory_space<vmem>>, vector<128x8xf32>
    %c1_28 = arith.constant 1 : index
    %c0_29 = arith.constant 0 : index
    %c0_30 = arith.constant 0 : index
    %29 = vector.load %arg5[%c1_28, %c0_29, %c0_30] : memref<9x8x128xf32, #tpu.memory_space<vmem>>, vector<1x8x128xf32>
    %30 = vector.shape_cast %29 : vector<1x8x128xf32> to vector<8x128xf32>
    %cst_31 = arith.constant dense<0.000000e+00> : vector<128x128xf32>
    %31 = tpu.matmul %28, %30, %cst_31 {dimension_numbers = #tpu.dot_dimension_numbers<[1], [0], [0], [1], [0, 0, 1, 1], [], []>} : vector<128x8xf32>, vector<8x128xf32>, vector<128x128xf32> -> vector<128x128xf32>
    %c0_32 = arith.constant 0 : index
    %c0_33 = arith.constant 0 : index
    %32 = vector.load %arg11[%c0_32, %c0_33] : memref<128x128xf32, #tpu.memory_space<vmem>>, vector<128x128xf32>
    %33 = arith.addf %32, %31 : vector<128x128xf32>
    %c0_34 = arith.constant 0 : index
    %c0_35 = arith.constant 0 : index
    %34 = vector.load %arg11[%c0_34, %c0_35] : memref<128x128xf32, #tpu.memory_space<vmem>>, vector<128x128xf32>
    tpu.vector_store %arg11[%c0_34, %c0_35], %33 {strides = array<i32>} : memref<128x128xf32, #tpu.memory_space<vmem>>, vector<128x128xf32>,
    %c2 = arith.constant 2 : index
    %c0_36 = arith.constant 0 : index
    %35 = vector.load %arg10[%c2, %c0_36] : memref<176x8xf32, #tpu.memory_space<vmem>>, vector<128x8xf32>
    %c2_37 = arith.constant 2 : index
    %c0_38 = arith.constant 0 : index
    %c0_39 = arith.constant 0 : index
    %36 = vector.load %arg5[%c2_37, %c0_38, %c0_39] : memref<9x8x128xf32, #tpu.memory_space<vmem>>, vector<1x8x128xf32>
    %37 = vector.shape_cast %36 : vector<1x8x128xf32> to vector<8x128xf32>
    %cst_40 = arith.constant dense<0.000000e+00> : vector<128x128xf32>
    %38 = tpu.matmul %35, %37, %cst_40 {dimension_numbers = #tpu.dot_dimension_numbers<[1], [0], [0], [1], [0, 0, 1, 1], [], []>} : vector<128x8xf32>, vector<8x128xf32>, vector<128x128xf32> -> vector<128x128xf32>
    %c0_41 = arith.constant 0 : index
    %c0_42 = arith.constant 0 : index
    %39 = vector.load %arg11[%c0_41, %c0_42] : memref<128x128xf32, #tpu.memory_space<vmem>>, vector<128x128xf32>
    %40 = arith.addf %39, %38 : vector<128x128xf32>
    %c0_43 = arith.constant 0 : index
    %c0_44 = arith.constant 0 : index
    %41 = vector.load %arg11[%c0_43, %c0_44] : memref<128x128xf32, #tpu.memory_space<vmem>>, vector<128x128xf32>
    tpu.vector_store %arg11[%c0_43, %c0_44], %40 {strides = array<i32>} : memref<128x128xf32, #tpu.memory_space<vmem>>, vector<128x128xf32>,
    %c16 = arith.constant 16 : index
    %c0_45 = arith.constant 0 : index
    %42 = vector.load %arg10[%c16, %c0_45] : memref<176x8xf32, #tpu.memory_space<vmem>>, vector<128x8xf32>
    %c3 = arith.constant 3 : index
    %c0_46 = arith.constant 0 : index
    %c0_47 = arith.constant 0 : index
    %43 = vector.load %arg5[%c3, %c0_46, %c0_47] : memref<9x8x128xf32, #tpu.memory_space<vmem>>, vector<1x8x128xf32>
    %44 = vector.shape_cast %43 : vector<1x8x128xf32> to vector<8x128xf32>
    %cst_48 = arith.constant dense<0.000000e+00> : vector<128x128xf32>
    %45 = tpu.matmul %42, %44, %cst_48 {dimension_numbers = #tpu.dot_dimension_numbers<[1], [0], [0], [1], [0, 0, 1, 1], [], []>} : vector<128x8xf32>, vector<8x128xf32>, vector<128x128xf32> -> vector<128x128xf32>
    %c0_49 = arith.constant 0 : index
    %c0_50 = arith.constant 0 : index
    %46 = vector.load %arg11[%c0_49, %c0_50] : memref<128x128xf32, #tpu.memory_space<vmem>>, vector<128x128xf32>
    %47 = arith.addf %46, %45 : vector<128x128xf32>
    %c0_51 = arith.constant 0 : index
    %c0_52 = arith.constant 0 : index
    %48 = vector.load %arg11[%c0_51, %c0_52] : memref<128x128xf32, #tpu.memory_space<vmem>>, vector<128x128xf32>
    tpu.vector_store %arg11[%c0_51, %c0_52], %47 {strides = array<i32>} : memref<128x128xf32, #tpu.memory_space<vmem>>, vector<128x128xf32>,
    %c17 = arith.constant 17 : index
    %c0_53 = arith.constant 0 : index
    %49 = vector.load %arg10[%c17, %c0_53] : memref<176x8xf32, #tpu.memory_space<vmem>>, vector<128x8xf32>
    %c4 = arith.constant 4 : index
    %c0_54 = arith.constant 0 : index
    %c0_55 = arith.constant 0 : index
    %50 = vector.load %arg5[%c4, %c0_54, %c0_55] : memref<9x8x128xf32, #tpu.memory_space<vmem>>, vector<1x8x128xf32>
    %51 = vector.shape_cast %50 : vector<1x8x128xf32> to vector<8x128xf32>
    %cst_56 = arith.constant dense<0.000000e+00> : vector<128x128xf32>
    %52 = tpu.matmul %49, %51, %cst_56 {dimension_numbers = #tpu.dot_dimension_numbers<[1], [0], [0], [1], [0, 0, 1, 1], [], []>} : vector<128x8xf32>, vector<8x128xf32>, vector<128x128xf32> -> vector<128x128xf32>
    %c0_57 = arith.constant 0 : index
    %c0_58 = arith.constant 0 : index
    %53 = vector.load %arg11[%c0_57, %c0_58] : memref<128x128xf32, #tpu.memory_space<vmem>>, vector<128x128xf32>
    %54 = arith.addf %53, %52 : vector<128x128xf32>
    %c0_59 = arith.constant 0 : index
    %c0_60 = arith.constant 0 : index
    %55 = vector.load %arg11[%c0_59, %c0_60] : memref<128x128xf32, #tpu.memory_space<vmem>>, vector<128x128xf32>
    tpu.vector_store %arg11[%c0_59, %c0_60], %54 {strides = array<i32>} : memref<128x128xf32, #tpu.memory_space<vmem>>, vector<128x128xf32>,
    %c18 = arith.constant 18 : index
    %c0_61 = arith.constant 0 : index
    %56 = vector.load %arg10[%c18, %c0_61] : memref<176x8xf32, #tpu.memory_space<vmem>>, vector<128x8xf32>
    %c5 = arith.constant 5 : index
    %c0_62 = arith.constant 0 : index
    %c0_63 = arith.constant 0 : index
    %57 = vector.load %arg5[%c5, %c0_62, %c0_63] : memref<9x8x128xf32, #tpu.memory_space<vmem>>, vector<1x8x128xf32>
    %58 = vector.shape_cast %57 : vector<1x8x128xf32> to vector<8x128xf32>
    %cst_64 = arith.constant dense<0.000000e+00> : vector<128x128xf32>
    %59 = tpu.matmul %56, %58, %cst_64 {dimension_numbers = #tpu.dot_dimension_numbers<[1], [0], [0], [1], [0, 0, 1, 1], [], []>} : vector<128x8xf32>, vector<8x128xf32>, vector<128x128xf32> -> vector<128x128xf32>
    %c0_65 = arith.constant 0 : index
    %c0_66 = arith.constant 0 : index
    %60 = vector.load %arg11[%c0_65, %c0_66] : memref<128x128xf32, #tpu.memory_space<vmem>>, vector<128x128xf32>
    %61 = arith.addf %60, %59 : vector<128x128xf32>
    %c0_67 = arith.constant 0 : index
    %c0_68 = arith.constant 0 : index
    %62 = vector.load %arg11[%c0_67, %c0_68] : memref<128x128xf32, #tpu.memory_space<vmem>>, vector<128x128xf32>
    tpu.vector_store %arg11[%c0_67, %c0_68], %61 {strides = array<i32>} : memref<128x128xf32, #tpu.memory_space<vmem>>, vector<128x128xf32>,
    %c32 = arith.constant 32 : index
    %c0_69 = arith.constant 0 : index
    %63 = vector.load %arg10[%c32, %c0_69] : memref<176x8xf32, #tpu.memory_space<vmem>>, vector<128x8xf32>
    %c6 = arith.constant 6 : index
    %c0_70 = arith.constant 0 : index
    %c0_71 = arith.constant 0 : index
    %64 = vector.load %arg5[%c6, %c0_70, %c0_71] : memref<9x8x128xf32, #tpu.memory_space<vmem>>, vector<1x8x128xf32>
    %65 = vector.shape_cast %64 : vector<1x8x128xf32> to vector<8x128xf32>
    %cst_72 = arith.constant dense<0.000000e+00> : vector<128x128xf32>
    %66 = tpu.matmul %63, %65, %cst_72 {dimension_numbers = #tpu.dot_dimension_numbers<[1], [0], [0], [1], [0, 0, 1, 1], [], []>} : vector<128x8xf32>, vector<8x128xf32>, vector<128x128xf32> -> vector<128x128xf32>
    %c0_73 = arith.constant 0 : index
    %c0_74 = arith.constant 0 : index
    %67 = vector.load %arg11[%c0_73, %c0_74] : memref<128x128xf32, #tpu.memory_space<vmem>>, vector<128x128xf32>
    %68 = arith.addf %67, %66 : vector<128x128xf32>
    %c0_75 = arith.constant 0 : index
    %c0_76 = arith.constant 0 : index
    %69 = vector.load %arg11[%c0_75, %c0_76] : memref<128x128xf32, #tpu.memory_space<vmem>>, vector<128x128xf32>
    tpu.vector_store %arg11[%c0_75, %c0_76], %68 {strides = array<i32>} : memref<128x128xf32, #tpu.memory_space<vmem>>, vector<128x128xf32>,
    %c33 = arith.constant 33 : index
    %c0_77 = arith.constant 0 : index
    %70 = vector.load %arg10[%c33, %c0_77] : memref<176x8xf32, #tpu.memory_space<vmem>>, vector<128x8xf32>
    %c7 = arith.constant 7 : index
    %c0_78 = arith.constant 0 : index
    %c0_79 = arith.constant 0 : index
    %71 = vector.load %arg5[%c7, %c0_78, %c0_79] : memref<9x8x128xf32, #tpu.memory_space<vmem>>, vector<1x8x128xf32>
    %72 = vector.shape_cast %71 : vector<1x8x128xf32> to vector<8x128xf32>
    %cst_80 = arith.constant dense<0.000000e+00> : vector<128x128xf32>
    %73 = tpu.matmul %70, %72, %cst_80 {dimension_numbers = #tpu.dot_dimension_numbers<[1], [0], [0], [1], [0, 0, 1, 1], [], []>} : vector<128x8xf32>, vector<8x128xf32>, vector<128x128xf32> -> vector<128x128xf32>
    %c0_81 = arith.constant 0 : index
    %c0_82 = arith.constant 0 : index
    %74 = vector.load %arg11[%c0_81, %c0_82] : memref<128x128xf32, #tpu.memory_space<vmem>>, vector<128x128xf32>
    %75 = arith.addf %74, %73 : vector<128x128xf32>
    %c0_83 = arith.constant 0 : index
    %c0_84 = arith.constant 0 : index
    %76 = vector.load %arg11[%c0_83, %c0_84] : memref<128x128xf32, #tpu.memory_space<vmem>>, vector<128x128xf32>
    tpu.vector_store %arg11[%c0_83, %c0_84], %75 {strides = array<i32>} : memref<128x128xf32, #tpu.memory_space<vmem>>, vector<128x128xf32>,
    %c34 = arith.constant 34 : index
    %c0_85 = arith.constant 0 : index
    %77 = vector.load %arg10[%c34, %c0_85] : memref<176x8xf32, #tpu.memory_space<vmem>>, vector<128x8xf32>
    %c8 = arith.constant 8 : index
    %c0_86 = arith.constant 0 : index
    %c0_87 = arith.constant 0 : index
    %78 = vector.load %arg5[%c8, %c0_86, %c0_87] : memref<9x8x128xf32, #tpu.memory_space<vmem>>, vector<1x8x128xf32>
    %79 = vector.shape_cast %78 : vector<1x8x128xf32> to vector<8x128xf32>
    %cst_88 = arith.constant dense<0.000000e+00> : vector<128x128xf32>
    %80 = tpu.matmul %77, %79, %cst_88 {dimension_numbers = #tpu.dot_dimension_numbers<[1], [0], [0], [1], [0, 0, 1, 1], [], []>} : vector<128x8xf32>, vector<8x128xf32>, vector<128x128xf32> -> vector<128x128xf32>
    %c0_89 = arith.constant 0 : index
    %c0_90 = arith.constant 0 : index
    %81 = vector.load %arg11[%c0_89, %c0_90] : memref<128x128xf32, #tpu.memory_space<vmem>>, vector<128x128xf32>
    %82 = arith.addf %81, %80 : vector<128x128xf32>
    %c0_91 = arith.constant 0 : index
    %c0_92 = arith.constant 0 : index
    %83 = vector.load %arg11[%c0_91, %c0_92] : memref<128x128xf32, #tpu.memory_space<vmem>>, vector<128x128xf32>
    tpu.vector_store %arg11[%c0_91, %c0_92], %82 {strides = array<i32>} : memref<128x128xf32, #tpu.memory_space<vmem>>, vector<128x128xf32>,
    %c0_93 = arith.constant 0 : index
    %c0_94 = arith.constant 0 : index
    %84 = vector.load %arg11[%c0_93, %c0_94] : memref<128x128xf32, #tpu.memory_space<vmem>>, vector<128x128xf32>
    %c0_95 = arith.constant 0 : index
    %c0_96 = arith.constant 0 : index
    %85 = vector.load %arg6[%c0_95, %c0_96] : memref<1x128xf32, #tpu.memory_space<vmem>>, vector<1x128xf32>
    %86 = vector.broadcast %85 : vector<1x128xf32> to vector<128x128xf32>
    %87 = arith.mulf %84, %86 : vector<128x128xf32>
    %c0_97 = arith.constant 0 : index
    %c0_98 = arith.constant 0 : index
    %88 = vector.load %arg7[%c0_97, %c0_98] : memref<1x128xf32, #tpu.memory_space<vmem>>, vector<1x128xf32>
    %89 = vector.broadcast %88 : vector<1x128xf32> to vector<128x128xf32>
    %90 = arith.addf %87, %89 : vector<128x128xf32>
    %cst_99 = arith.constant 0.000000e+00 : f32
    %91 = vector.broadcast %cst_99 : f32 to vector<128x128xf32>
    %92 = arith.maximumf %90, %91 : vector<128x128xf32>
    %93 = arith.truncf %92 : vector<128x128xf32> to vector<128x128xbf16>
    %c0_100 = arith.constant 0 : index
    %c0_101 = arith.constant 0 : index
    %c0_102 = arith.constant 0 : index
    %94 = vector.load %arg9[%c0_100, %c0_101, %c0_102] : memref<1x128x128xbf16, #tpu.memory_space<vmem>>, vector<1x128x128xbf16>
    %95 = vector.shape_cast %94 : vector<1x128x128xbf16> to vector<128x128xbf16>
    %96 = vector.shape_cast %93 : vector<128x128xbf16> to vector<1x128x128xbf16>
    tpu.vector_store %arg9[%c0_100, %c0_101, %c0_102], %96 {strides = array<i32>} : memref<1x128x128xbf16, #tpu.memory_space<vmem>>, vector<1x128x128xbf16>,
    return
  }
  func.func @transform_0(%arg0: i32) -> (i32, i32, i32) {
    %c0_i32 = arith.constant 0 : i32
    %c0_i32_0 = arith.constant 0 : i32
    %c0_i32_1 = arith.constant 0 : i32
    return %arg0, %c0_i32, %c0_i32_0 : i32, i32, i32
  }
  func.func @transform_1(%arg0: i32) -> (i32, i32) {
    %c0_i32 = arith.constant 0 : i32
    %c0_i32_0 = arith.constant 0 : i32
    %c0_i32_1 = arith.constant 0 : i32
    return %c0_i32, %c0_i32_0 : i32, i32
  }
  func.func @transform_2(%arg0: i32) -> (i32, i32) {
    %c0_i32 = arith.constant 0 : i32
    %c0_i32_0 = arith.constant 0 : i32
    %c0_i32_1 = arith.constant 0 : i32
    return %c0_i32, %c0_i32_0 : i32, i32
  }
  func.func @transform_3(%arg0: i32) -> (i32, i32) {
    %c0_i32 = arith.constant 0 : i32
    %c0_i32_0 = arith.constant 0 : i32
    %c0_i32_1 = arith.constant 0 : i32
    return %c0_i32, %c0_i32_0 : i32, i32
  }
  func.func @transform_4(%arg0: i32) -> (i32, i32, i32) {
    %c0_i32 = arith.constant 0 : i32
    %c0_i32_0 = arith.constant 0 : i32
    %c0_i32_1 = arith.constant 0 : i32
    %c0_i32_2 = arith.constant 0 : i32
    return %c0_i32, %c0_i32_0, %c0_i32_1 : i32, i32, i32
  }
  func.func @transform_5(%arg0: i32) -> (i32, i32) {
    %c0_i32 = arith.constant 0 : i32
    %c0_i32_0 = arith.constant 0 : i32
    %c0_i32_1 = arith.constant 0 : i32
    return %c0_i32, %c0_i32_0 : i32, i32
  }
  func.func @transform_6(%arg0: i32) -> (i32, i32) {
    %c0_i32 = arith.constant 0 : i32
    %c0_i32_0 = arith.constant 0 : i32
    %c0_i32_1 = arith.constant 0 : i32
    return %c0_i32, %c0_i32_0 : i32, i32
  }
  func.func @transform_7(%arg0: i32) -> (i32, i32, i32) {
    %c0_i32 = arith.constant 0 : i32
    %c0_i32_0 = arith.constant 0 : i32
    %c0_i32_1 = arith.constant 0 : i32
    %c0_i32_2 = arith.constant 0 : i32
    return %c0_i32, %c0_i32_0, %c0_i32_1 : i32, i32, i32
  }
  func.func @transform_8(%arg0: i32) -> (i32, i32, i32) {
    %c0_i32 = arith.constant 0 : i32
    %c0_i32_0 = arith.constant 0 : i32
    %c0_i32_1 = arith.constant 0 : i32
    return %arg0, %c0_i32, %c0_i32_0 : i32, i32, i32
  }
}

</mosaic_0001>

<bundles_post_ra>
// kernel: feature_encoder_forward.1
= control target key start
LH: loop header
LB: loop body
LE: loop exit
PB: predicated region body
PF: predicated region fallthrough
CT: control target
= control target key end

     0   :  { %s3554_s27 = smov 0   ;;  %s4746_s0 = inlined_call_operand.vmem [shape: bf16[2,256,40], index: 0, kind: input, shape index: {}]   ;;  %s4747_s1 = inlined_call_operand.vmem [shape: bf16[40,8], index: 1, kind: input, shape index: {}]   ;;  %s4748_s2 = inlined_call_operand.vmem [shape: f32[1,8], index: 2, kind: input, shape index: {}]   ;;  %s4749_s3 = inlined_call_operand.vmem [shape: f32[1,8], index: 3, kind: input, shape index: {}]   ;;  %s4750_s4 = inlined_call_operand.vmem [shape: f32[9,8,128], index: 4, kind: input, shape index: {}]   ;;  %s4751_s5 = inlined_call_operand.vmem [shape: f32[1,128], index: 5, kind: input, shape index: {}]   ;;  %s4752_s6 = inlined_call_operand.vmem [shape: f32[1,128], index: 6, kind: input, shape index: {}]   ;;  %s4753_s7 = inlined_call_operand.vmem [shape: f32[2,176,240], index: 7, kind: input, shape index: {}]   ;;  %s4754_s8 = inlined_call_operand.vmem [shape: bf16[2,128,128], index: 8, kind: output, shape index: {}]  }
   0x1 LB: > { %s3051_s28 = sadd.s32 4294967295, %s3507_s27   ;;  %p3055_p0 = scmp.ge.s32.totalorder %s3507_s27, 1  ;;  %s3507_s27 = sphi %s3554_s27, %s18_s27  }
   0x2   : > { %p262_p1 = scmp.lt.s32.totalorder %s3507_s27, 3 }
   0x4   : > { %p263_p2 = pnand %p3055_p0, %p262_p1 }
   0x5   : > { %p296_p3 = scmp.lt.s32.totalorder (!%p263_p2), %s3051_s28, 1 }
   0x6   : > { %266 = sbr.rel (%p263_p2) target bundleno = 1285 (0x505), region = 52 }
   0xb   : > { %v343_v0 = vld [vmem:[%s4747_s1 + $0x10] sm:$0xf]  ;;  %vm488_vm0 = vcmask 1043456   ;;  %s4756_s28 = smov (!%p296_p3, %s3051_s28), 1  ;;  %v3409_v4 = vld [vmem:[%s4747_s1 + $0x8] sm:$0xff]  ;;  %v3408_v5 = vld [vmem:[%s4747_s1] sm:$0xff] }
   0xc   : > { %v433_v1 = vunpack.c.l.b16 %v343_v0  ;;  %s3390_s11 = sshll.u32 %s4756_s28, 7  ;;  %vm439_vm1 = vcmask 326656   ;;  %v3600_v17 = vld [vmem:[%s4748_s2] ss:$0 sm:$0xff]  ;;  %vm759_vm2 = vcmask 916480   ;;  %vm1291_vm3 = vcmask 64512  }
   0xd   : > { %s3577_s16 = scalar_lea.vmem %s4746_s0, %s3390_s11  ;;  %v3606_v19 = vld [vmem:[%s4749_s3] ss:$0 sm:$0xff]  ;;  %s3391_s19 = sshll.u32 %s4756_s28, 6 }
   0xe   : > { %v436_v2 = vpack.c.b16 %v433_v1, %v433_v1  ;;  %v3392_v6 = vld [vmem:[%s3577_s16] sm:$0xff]  ;;  %v3393_v7 = vld [vmem:[%s3577_s16 + $0x8] sm:$0xff]  ;;  %v3394_v8 = vld [vmem:[%s3577_s16 + $0x10] sm:$0xff]  ;;  %s4692_s22 = scalar_lea.vmem %s4754_s8, %s3391_s19 }
   0xf   : > { %v3395_v9 = vld [vmem:[%s3577_s16 + $0x18] sm:$0xff]  ;;  %v3396_v10 = vld [vmem:[%s3577_s16 + $0x20] sm:$0xff]  ;;  %v3397_v11 = vld [vmem:[%s3577_s16 + $0x28] sm:$0xff] }
  0x10   : > { %v490_v3 = vsel %vm488_vm0, %v436_v2, 0  ;;  %v3398_v12 = vld [vmem:[%s3577_s16 + $0x30] sm:$0xff]  ;;  %v3399_v13 = vld [vmem:[%s3577_s16 + $0x38] sm:$0xff]  ;;  %v3400_v14 = vld [vmem:[%s3577_s16 + $0x40] sm:$0xff] }
  0x11   : > { %497 = vmatpush.bf16.msra.mxu0 %v490_v3  ;;  %v3401_v20 = vld [vmem:[%s3577_s16 + $0x48] sm:$0xff]  ;;  %v3402_v36 = vld [vmem:[%s3577_s16 + $0x50] sm:$0xff]  ;;  %v3403_v47 = vld [vmem:[%s3577_s16 + $0x58] sm:$0xff] }
  0x12   : > { %v3404_v58 = vld [vmem:[%s3577_s16 + $0x60] sm:$0xff]  ;;  %v3405_v61 = vld [vmem:[%s3577_s16 + $0x68] sm:$0xff]  ;;  %v3406_v0 = vld [vmem:[%s3577_s16 + $0x70] sm:$0xff] }
  0x13   : > { %v3407_v3 = vld [vmem:[%s3577_s16 + $0x78] sm:$0xff] }
  0x15   : > { %498 = vmatpush.bf16.msra.mxu0 %v3409_v4 }
  0x19   : > { %499 = vmatpush.bf16.msra.mxu0 %v3408_v5 }
  0x1c   : > { %3132 = vmatmul.msk.bf16.vlgmr.msra.gmra.mxu0 %vm439_vm1, %v3392_v6 }
  0x2c   : > { %3133 = vmatmul.msk.bf16.gmra.mxu0 %vm439_vm1, %v3393_v7 }
  0x3c   : > { %3134 = vmatmul.msk.bf16.gmra.mxu0 %vm439_vm1, %v3394_v8 }
  0x4c   : > { %3135 = vmatmul.msk.bf16.gmra.mxu0 %vm439_vm1, %v3395_v9 }
  0x5c   : > { %3136 = vmatmul.msk.bf16.gmra.mxu0 %vm439_vm1, %v3396_v10 }
  0x6c   : > { %3137 = vmatmul.msk.bf16.gmra.mxu0 %vm439_vm1, %v3397_v11 }
  0x7c   : > { %3138 = vmatmul.msk.bf16.gmra.mxu0 %vm439_vm1, %v3398_v12 }
  0x8c   : > { %3139 = vmatmul.msk.bf16.gmra.mxu0 %vm439_vm1, %v3399_v13 }
  0x99   : > { %v501_v15 = vpop.f32.mrf.mxu0 }
  0x9a   : > { %v585_v18 = vmul.f32 %v3600_v17, %v501_v15 }
  0x9c   : > { %3140 = vmatmul.msk.bf16.gmra.mxu0 %vm439_vm1, %v3400_v14  ;;  %v621_v22 = vadd.f32 %v3606_v19, %v585_v18 }
  0x9e   : > { %v653_v25 = vmax.f32 %v621_v22, 0.0 }
  0xa1   : > { %v503_v16 = vpop.f32.mrf.mxu0 }
  0xa2   : > { %v586_v26 = vmul.f32 %v3600_v17, %v503_v16 }
  0xa4   : > { %v622_v30 = vadd.f32 %v3606_v19, %v586_v26 }
  0xa6   : > { %v654_v33 = vmax.f32 %v622_v30, 0.0 }
  0xa9   : > { %v506_v21 = vpop.f32.mrf.mxu0 }
  0xaa   : > { %v587_v23 = vmul.f32 %v3600_v17, %v506_v21 }
  0xac   : > { %v623_v24 = vadd.f32 %v3606_v19, %v587_v23  ;;  %3141 = vmatmul.msk.bf16.gmra.mxu0 %vm439_vm1, %v3401_v20 }
  0xae   : > { %v655_v27 = vmax.f32 %v623_v24, 0.0 }
  0xb0   : > { %v3614_v28 = vmax.f32 %v653_v25, %v655_v27 }
  0xb1   : > { %v508_v29 = vpop.f32.mrf.mxu0 }
  0xb2   : > { %v588_v31 = vmul.f32 %v3600_v17, %v508_v29 }
  0xb4   : > { %v624_v32 = vadd.f32 %v3606_v19, %v588_v31 }
  0xb6   : > { %v656_v34 = vmax.f32 %v624_v32, 0.0 }
  0xb8   : > { %v3619_v35 = vmax.f32 %v654_v33, %v656_v34 }
  0xb9   : > { %v511_v37 = vpop.f32.mrf.mxu0 }
  0xba   : > { %v589_v38 = vmul.f32 %v3600_v17, %v511_v37 }
  0xbc   : > { %v625_v39 = vadd.f32 %v3606_v19, %v589_v38  ;;  %3142 = vmatmul.msk.bf16.gmra.mxu0 %vm439_vm1, %v3402_v36 }
  0xbe   : > { %v657_v40 = vmax.f32 %v625_v39, 0.0 }
  0xc0   : > { %v3625_v41 = vmax.f32 %v655_v27, %v657_v40 }
  0xc1   : > { %v513_v42 = vpop.f32.mrf.mxu0 }
  0xc2   : > { %v590_v43 = vmul.f32 %v3600_v17, %v513_v42 }
  0xc4   : > { %v626_v44 = vadd.f32 %v3606_v19, %v590_v43 }
  0xc6   : > { %v658_v45 = vmax.f32 %v626_v44, 0.0 }
  0xc8   : > { %v3629_v46 = vmax.f32 %v656_v34, %v658_v45 }
  0xc9   : > { %v516_v48 = vpop.f32.mrf.mxu0 }
  0xca   : > { %v591_v49 = vmul.f32 %v3600_v17, %v516_v48 }
  0xcc   : > { %v3634_v50 = vadd.f32 %v3606_v19, %v591_v49  ;;  %3143 = vmatmul.msk.bf16.gmra.mxu0 %vm439_vm1, %v3403_v47 }
  0xce   : > { %v659_v51 = vmax.f32 %v3634_v50, 0.0 }
  0xd0   : > { %v3640_v52 = vmax.f32 %v657_v40, %v659_v51 }
  0xd1   : > { %v518_v53 = vpop.f32.mrf.mxu0 }
  0xd2   : > { %v592_v54 = vmul.f32 %v3600_v17, %v518_v53 }
  0xd4   : > { %v3644_v55 = vadd.f32 %v3606_v19, %v592_v54 }
  0xd6   : > { %v660_v56 = vmax.f32 %v3644_v55, 0.0 }
  0xd8   : > { %v3649_v57 = vmax.f32 %v658_v45, %v660_v56 }
  0xd9   : > { %v521_v59 = vpop.f32.mrf.mxu0 }
  0xda   : > { %v593_v36 = vmul.f32 %v3600_v17, %v521_v59 }
  0xdc   : > { %3144 = vmatmul.msk.bf16.gmra.mxu0 %vm439_vm1, %v3404_v58  ;;  %v629_v44 = vadd.f32 %v3606_v19, %v593_v36  ;;  %v715_v36 = vld [vmem:[%s4753_s7] sm:$0xff] }
  0xde   : > { %v661_v54 = vmax.f32 %v629_v44, 0.0 }
  0xe1   : > { %v523_v60 = vpop.f32.mrf.mxu0 }
  0xe2   : > { %v594_v31 = vmul.f32 %v3600_v17, %v523_v60 }
  0xe4   : > { %v630_v40 = vadd.f32 %v3606_v19, %v594_v31 }
  0xe6   : > { %v662_v49 = vmax.f32 %v630_v40, 0.0 }
  0xe8   : > { %v692_v60 = vmax.f32 %v660_v56, %v662_v49 }
  0xe9   : > { %v526_v62 = vpop.f32.mrf.mxu0 }
  0xea   : > { %v595_v25 = vmul.f32 %v3600_v17, %v526_v62  ;;  %v691_v62 = vmax.f32 %v659_v51, %v661_v54 }
  0xec   : > { %3145 = vmatmul.msk.bf16.gmra.mxu0 %vm439_vm1, %v3405_v61  ;;  %v631_v37 = vadd.f32 %v3606_v19, %v595_v25 }
  0xee   : > { %v663_v45 = vmax.f32 %v631_v37, 0.0 }
  0xf0   : > { %v693_v59 = vmax.f32 %v661_v54, %v663_v45 }
  0xf1   : > { %v528_v63 = vpop.f32.mrf.mxu0 }
  0xf2   : > { %v596_v20 = vmul.f32 %v3600_v17, %v528_v63  ;;  %v753_v63 = vld [vmem:[%s4753_s7 + $0x130] sm:$0xff] }
  0xf4   : > { %v632_v32 = vadd.f32 %v3606_v19, %v596_v20 }
  0xf6   : > { %v664_v42 = vmax.f32 %v632_v32, 0.0 }
  0xf8   : > { %v694_v58 = vmax.f32 %v662_v49, %v664_v42 }
  0xf9   : > { %v531_v1 = vpop.f32.mrf.mxu0 }
  0xfa   : > { %v597_v15 = vmul.f32 %v3600_v17, %v531_v1 }
  0xfc   : > { %3146 = vmatmul.msk.bf16.gmra.mxu0 %vm439_vm1, %v3406_v0  ;;  %v633_v26 = vadd.f32 %v3606_v19, %v597_v15 }
  0xfe   : > { %v665_v38 = vmax.f32 %v633_v26, 0.0 }
 0x100   : > { %v695_v53 = vmax.f32 %v663_v45, %v665_v38 }
 0x101   : > { %v533_v2 = vpop.f32.mrf.mxu0 }
 0x102   : > { %v598_v11 = vmul.f32 %v3600_v17, %v533_v2  ;;  %v757_v2 = vld [vmem:[%s4753_s7 + $0x150] sm:$0xff] }
 0x104   : > { %v634_v21 = vadd.f32 %v3606_v19, %v598_v11 }
 0x106   : > { %v666_v33 = vmax.f32 %v634_v21, 0.0 }
 0x108   : > { %v696_v47 = vmax.f32 %v664_v42, %v666_v33 }
 0x109   : > { %v536_v4 = vpop.f32.mrf.mxu0 }
 0x10a   : > { %v599_v9 = vmul.f32 %v3600_v17, %v536_v4 }
 0x10c   : > { %3147 = vmatmul.msk.bf16.gmra.mxu0 %vm439_vm1, %v3407_v3  ;;  %v635_v16 = vadd.f32 %v3606_v19, %v599_v9 }
 0x10e   : > { %v667_v27 = vmax.f32 %v635_v16, 0.0 }
 0x110   : > { %v697_v43 = vmax.f32 %v665_v38, %v667_v27 }
 0x111   : > { %v538_v5 = vpop.f32.mrf.mxu0 }
 0x112   : > { %v600_v7 = vmul.f32 %v3600_v17, %v538_v5 }
 0x114   : > { %v636_v12 = vadd.f32 %v3606_v19, %v600_v7 }
 0x116   : > { %v668_v22 = vmax.f32 %v636_v12, 0.0 }
 0x118   : > { %v698_v39 = vmax.f32 %v666_v33, %v668_v22 }
 0x119   : > { %v541_v6 = vpop.f32.mrf.mxu0 }
 0x11a   : > { %v601_v8 = vmul.f32 %v3600_v17, %v541_v6 }
 0x11c   : > { %v3665_v13 = vadd.f32 %v3606_v19, %v601_v8 }
 0x11e   : > { %v669_v23 = vmax.f32 %v3665_v13, 0.0  ;;  %v718_v13 = vld [vmem:[%s4753_s7 + $0x18] sm:$0xff] }
 0x120   : > { %v699_v34 = vmax.f32 %v667_v27, %v669_v23 }
 0x121   : > { %v543_v10 = vpop.f32.mrf.mxu0 }
 0x122   : > { %v602_v14 = vmul.f32 %v3600_v17, %v543_v10 }
 0x124   : > { %v3671_v18 = vadd.f32 %v3606_v19, %v602_v14 }
 0x126   : > { %v670_v24 = vmax.f32 %v3671_v18, 0.0  ;;  %v723_v18 = vld [vmem:[%s4753_s7 + $0x40] sm:$0xff] }
 0x128   : > { %v700_v29 = vmax.f32 %v668_v22, %v670_v24 }
 0x129   : > { %v3681_v30 = vpop.f32.mrf.mxu0 }
 0x12a   : > { %826 = vmatpush.msra.mxu1 %v700_v29  ;;  %3457 = vmatpush.msra.mxu2 %v700_v29 }
 0x12b   : > { %1103 = vmatpush.msrb.mxu0 %v700_v29  ;;  %3473 = vmatpush.msra.mxu3 %v700_v29 }
 0x12c   : > { %827 = vmatpush.msra.mxu1 %v699_v34  ;;  %3458 = vmatpush.msra.mxu2 %v699_v34 }
 0x12d   : > { %1104 = vmatpush.msrb.mxu0 %v699_v34  ;;  %3474 = vmatpush.msra.mxu3 %v699_v34 }
 0x12e   : > { %828 = vmatpush.msra.mxu1 %v698_v39  ;;  %3459 = vmatpush.msra.mxu2 %v698_v39 }
 0x12f   : > { %1105 = vmatpush.msrb.mxu0 %v698_v39  ;;  %3475 = vmatpush.msra.mxu3 %v698_v39 }
 0x130   : > { %829 = vmatpush.msra.mxu1 %v697_v43  ;;  %3460 = vmatpush.msra.mxu2 %v697_v43 }
 0x131   : > { %1106 = vmatpush.msrb.mxu0 %v697_v43  ;;  %3476 = vmatpush.msra.mxu3 %v697_v43  ;;  %v3691_v48 = vpop.f32.mrf.mxu0 }
 0x132   : > { %830 = vmatpush.msra.mxu1 %v696_v47  ;;  %3461 = vmatpush.msra.mxu2 %v696_v47 }
 0x133   : > { %1107 = vmatpush.msrb.mxu0 %v696_v47  ;;  %3477 = vmatpush.msra.mxu3 %v696_v47 }
 0x134   : > { %831 = vmatpush.msra.mxu1 %v695_v53  ;;  %3462 = vmatpush.msra.mxu2 %v695_v53 }
 0x135   : > { %1108 = vmatpush.msrb.mxu0 %v695_v53  ;;  %3478 = vmatpush.msra.mxu3 %v695_v53 }
 0x136   : > { %832 = vmatpush.msra.mxu1 %v694_v58  ;;  %3463 = vmatpush.msra.mxu2 %v694_v58 }
 0x137   : > { %1109 = vmatpush.msrb.mxu0 %v694_v58  ;;  %3479 = vmatpush.msra.mxu3 %v694_v58  ;;  %v604_v58 = vmul.f32 %v3600_v17, %v3691_v48 }
 0x138   : > { %833 = vmatpush.msra.mxu1 %v693_v59  ;;  %3464 = vmatpush.msra.mxu2 %v693_v59 }
 0x139   : > { %1110 = vmatpush.msrb.mxu0 %v693_v59  ;;  %3480 = vmatpush.msra.mxu3 %v693_v59  ;;  %v3695_v61 = vpop.f32.mrf.mxu0  ;;  %v640_v48 = vadd.f32 %v3606_v19, %v604_v58  ;;  %v3170_v58 = vld [vmem:[%s4753_s7 + $0x160] sm:$0xff] }
 0x13a   : > { %834 = vmatpush.msra.mxu1 %v692_v60  ;;  %3465 = vmatpush.msra.mxu2 %v692_v60  ;;  %v605_v47 = vmul.f32 %v3600_v17, %v3695_v61  ;;  %v603_v61 = vmul.f32 %v3600_v17, %v3681_v30 }
 0x13b   : > { %1111 = vmatpush.msrb.mxu0 %v692_v60  ;;  %3481 = vmatpush.msra.mxu3 %v692_v60 }
 0x13c   : > { %835 = vmatpush.msra.mxu1 %v691_v62  ;;  %3466 = vmatpush.msra.mxu2 %v691_v62 }
 0x13d   : > { %1112 = vmatpush.msrb.mxu0 %v691_v62  ;;  %3482 = vmatpush.msra.mxu3 %v691_v62 }
 0x13e   : > { %836 = vmatpush.msra.mxu1 %v3649_v57  ;;  %3467 = vmatpush.msra.mxu2 %v3649_v57 }
 0x13f   : > { %1113 = vmatpush.msrb.mxu0 %v3649_v57  ;;  %3483 = vmatpush.msra.mxu3 %v3649_v57  ;;  %v751_v57 = vld [vmem:[%s4753_s7 + $0x120] sm:$0xff] }
 0x140   : > { %837 = vmatpush.msra.mxu1 %v3640_v52  ;;  %3468 = vmatpush.msra.mxu2 %v3640_v52 }
 0x141   : > { %1114 = vmatpush.msrb.mxu0 %v3640_v52  ;;  %3484 = vmatpush.msra.mxu3 %v3640_v52  ;;  %v3707_v50 = vpop.f32.mrf.mxu0 }
 0x142   : > { %838 = vmatpush.msra.mxu1 %v3629_v46  ;;  %3469 = vmatpush.msra.mxu2 %v3629_v46  ;;  %v606_v42 = vmul.f32 %v3600_v17, %v3707_v50  ;;  %v717_v50 = vld [vmem:[%s4753_s7 + $0x10] sm:$0xff] }
 0x143   : > { %1115 = vmatpush.msrb.mxu0 %v3629_v46  ;;  %3485 = vmatpush.msra.mxu3 %v3629_v46 }
 0x144   : > { %839 = vmatpush.msra.mxu1 %v3625_v41  ;;  %3470 = vmatpush.msra.mxu2 %v3625_v41  ;;  %v642_v59 = vadd.f32 %v3606_v19, %v606_v42  ;;  %v746_v42 = vld [vmem:[%s4753_s7 + $0xf8] sm:$0xff] }
 0x145   : > { %1116 = vmatpush.msrb.mxu0 %v3625_v41  ;;  %3486 = vmatpush.msra.mxu3 %v3625_v41 }
 0x146   : > { %840 = vmatpush.msra.mxu1 %v3619_v35  ;;  %3471 = vmatpush.msra.mxu2 %v3619_v35 }
 0x147   : > { %1117 = vmatpush.msrb.mxu0 %v3619_v35  ;;  %3487 = vmatpush.msra.mxu3 %v3619_v35 }
 0x148   : > { %841 = vmatpush.msra.mxu1 %v3614_v28  ;;  %3472 = vmatpush.msra.mxu2 %v3614_v28 }
 0x149   : > { %1118 = vmatpush.msrb.mxu0 %v3614_v28  ;;  %3488 = vmatpush.msra.mxu3 %v3614_v28  ;;  %v556_v46 = vpop.f32.mrf.mxu0  ;;  %v755_v28 = vld [vmem:[%s4753_s7 + $0x140] sm:$0xff] }
 0x14a   : > { %896 = vmatmul.f32.vlgmr.msra.gmra.mxu2 %v751_v57  ;;  %v607_v37 = vmul.f32 %v3600_v17, %v556_v46  ;;  %842 = vmatmul.f32.vlgmr.msra.gmra.mxu1 %v715_v36  ;;  %v641_v46 = vadd.f32 %v3606_v19, %v605_v47  ;;  %v750_v47 = vld [vmem:[%s4753_s7 + $0x118] sm:$0xff] }
 0x14b   : > { %1119 = vmatmul.f32.vlgmr.msrb.gmra.mxu0 %v3170_v58 }
 0x14c   : > { %v643_v49 = vadd.f32 %v3606_v19, %v607_v37  ;;  %v747_v37 = vld [vmem:[%s4753_s7 + $0x100] sm:$0xff] }
 0x151   : > { %v558_v51 = vpop.f32.mrf.mxu0 }
 0x152   : > { %899 = vmatmul.f32.gmra.mxu2 %v753_v63  ;;  %v608_v31 = vmul.f32 %v3600_v17, %v558_v51  ;;  %845 = vmatmul.f32.gmra.mxu1 %v717_v50  ;;  %v3252_v50 = vld [vmem:[%s4750_s4 + $0x8] sm:$0xff] }
 0x153   : > { %1541 = vmatpush.msrb.mxu3 %v3252_v50 }
 0x154   : > { %v644_v43 = vadd.f32 %v3606_v19, %v608_v31 }
 0x156   : > { %v676_v62 = vmax.f32 %v644_v43, 0.0 }
 0x159   : > { %v561_v52 = vpop.f32.mrf.mxu0 }
 0x15a   : > { %902 = vmatmul.f32.gmra.mxu2 %v755_v28  ;;  %v609_v25 = vmul.f32 %v3600_v17, %v561_v52  ;;  %v675_v52 = vmax.f32 %v643_v49, 0.0 }
 0x15c   : > { %v645_v38 = vadd.f32 %v3606_v19, %v609_v25  ;;  %v736_v25 = vld [vmem:[%s4753_s7 + $0xa8] sm:$0xff] }
 0x15e   : > { %v677_v54 = vmax.f32 %v645_v38, 0.0  ;;  %v744_v38 = vld [vmem:[%s4753_s7 + $0xe8] sm:$0xff] }
 0x161   : > { %v563_v41 = vpop.f32.mrf.mxu0 }
 0x162   : > { %905 = vmatmul.f32.gmra.mxu2 %v757_v2  ;;  %v610_v15 = vmul.f32 %v3600_v17, %v563_v41  ;;  %v707_v41 = vmax.f32 %v675_v52, %v677_v54 }
 0x164   : > { %v646_v32 = vadd.f32 %v3606_v19, %v610_v15  ;;  %v735_v15 = vld [vmem:[%s4753_s7 + $0xa0] sm:$0xff] }
 0x166   : > { %v678_v45 = vmax.f32 %v646_v32, 0.0  ;;  %v740_v32 = vld [vmem:[%s4753_s7 + $0xc8] sm:$0xff] }
 0x168   : > { %v708_v51 = vmax.f32 %v676_v62, %v678_v45 }
 0x169   : > { %v566_v55 = vpop.f32.mrf.mxu0 }
 0x16a   : > { %v611_v11 = vmul.f32 %v3600_v17, %v566_v55  ;;  %v674_v55 = vmax.f32 %v642_v59, 0.0  ;;  %v3178_v59 = vld [vmem:[%s4753_s7 + $0x1a0] sm:$0xff] }
 0x16b   : > { %1131 = vmatmul.f32.vlgmr.msra.gmra.mxu3 %v3178_v59 }
 0x16c   : > { %v647_v26 = vadd.f32 %v3606_v19, %v611_v11  ;;  %v706_v57 = vmax.f32 %v674_v55, %v676_v62  ;;  %v728_v11 = vld [vmem:[%s4753_s7 + $0x68] sm:$0xff] }
 0x16e   : > { %v679_v40 = vmax.f32 %v647_v26, 0.0  ;;  %v741_v26 = vld [vmem:[%s4753_s7 + $0xd0] sm:$0xff] }
 0x170   : > { %v709_v60 = vmax.f32 %v677_v54, %v679_v40 }
 0x171   : > { %v568_v56 = vpop.f32.mrf.mxu0 }
 0x172   : > { %v612_v7 = vmul.f32 %v3600_v17, %v568_v56  ;;  %v639_v56 = vadd.f32 %v3606_v19, %v603_v61  ;;  %v3172_v61 = vld [vmem:[%s4753_s7 + $0x170] sm:$0xff] }
 0x173   : > { %1122 = vmatmul.f32.gmra.mxu0 %v3172_v61  ;;  %v3212_v61 = vld [vmem:[%s4753_s7 + $0x2b0] sm:$0xff] }
 0x174   : > { %v648_v16 = vadd.f32 %v3606_v19, %v612_v7  ;;  %v671_v28 = vmax.f32 %v639_v56, 0.0  ;;  %v724_v7 = vld [vmem:[%s4753_s7 + $0x48] sm:$0xff]  ;;  %v758_v56 = vld [vmem:[%s4753_s7 + $0x158] sm:$0xff] }
 0x176   : > { %v680_v34 = vmax.f32 %v648_v16, 0.0  ;;  %v701_v2 = vmax.f32 %v669_v23, %v671_v28  ;;  %v720_v23 = vld [vmem:[%s4753_s7 + $0x28] sm:$0xff] }
 0x177   : > { %v732_v16 = vld [vmem:[%s4753_s7 + $0x88] sm:$0xff] }
 0x178   : > { %v710_v53 = vmax.f32 %v678_v45, %v680_v34 }
 0x179   : > { %v571_v35 = vpop.f32.mrf.mxu0 }
 0x17a   : > { %v613_v5 = vmul.f32 %v3600_v17, %v571_v35  ;;  %v673_v35 = vmax.f32 %v641_v46, 0.0  ;;  %v3180_v46 = vld [vmem:[%s4753_s7 + $0x1b0] sm:$0xff] }
 0x17b   : > { %1134 = vmatmul.f32.gmra.mxu3 %v3180_v46 }
 0x17c   : > { %v649_v12 = vadd.f32 %v3606_v19, %v613_v5  ;;  %v705_v63 = vmax.f32 %v673_v35, %v675_v52  ;;  %v722_v5 = vld [vmem:[%s4753_s7 + $0x38] sm:$0xff]  ;;  %v1330_v52 = vld [vmem:[%s4750_s4] sm:$0xff] }
 0x17d   : > { %1394 = vmatpush.msrb.mxu1 %v1330_v52  ;;  %v3201_v52 = vld [vmem:[%s4753_s7 + $0x258] sm:$0xff] }
 0x17e   : > { %v681_v29 = vmax.f32 %v649_v12, 0.0  ;;  %v733_v12 = vld [vmem:[%s4753_s7 + $0x90] sm:$0xff] }
 0x180   : > { %v711_v44 = vmax.f32 %v679_v40, %v681_v29 }
 0x181   : > { %v573_v0 = vpop.f32.mrf.mxu0 }
 0x182   : > { %v614_v3 = vmul.f32 %v3600_v17, %v573_v0  ;;  %v672_v0 = vmax.f32 %v640_v48, 0.0 }
 0x184   : > { %v650_v8 = vadd.f32 %v3606_v19, %v614_v3  ;;  %v704_v30 = vmax.f32 %v672_v0, %v674_v55  ;;  %v716_v3 = vld [vmem:[%s4753_s7 + $0x8] sm:$0xff]  ;;  %v3182_v55 = vld [vmem:[%s4753_s7 + $0x1c0] sm:$0xff] }
 0x185   : > { %1137 = vmatmul.f32.gmra.mxu3 %v3182_v55 }
 0x186   : > { %v682_v20 = vmax.f32 %v650_v8, 0.0  ;;  %v729_v8 = vld [vmem:[%s4753_s7 + $0x70] sm:$0xff] }
 0x188   : > { %v712_v39 = vmax.f32 %v680_v34, %v682_v20  ;;  %v742_v34 = vld [vmem:[%s4753_s7 + $0xd8] sm:$0xff] }
 0x189   : > { %v576_v1 = vpop.f32.mrf.mxu0 }
 0x18a   : > { %v615_v4 = vmul.f32 %v3600_v17, %v576_v1  ;;  %v703_v1 = vmax.f32 %v671_v28, %v673_v35  ;;  %v3176_v35 = vld [vmem:[%s4753_s7 + $0x190] sm:$0xff]  ;;  %v3173_v28 = vld [vmem:[%s4753_s7 + $0x178] sm:$0xff] }
 0x18c   : > { %v651_v9 = vadd.f32 %v3606_v19, %v615_v4  ;;  %v721_v4 = vld [vmem:[%s4753_s7 + $0x30] sm:$0xff] }
 0x18e   : > { %v683_v22 = vmax.f32 %v651_v9, 0.0  ;;  %v726_v9 = vld [vmem:[%s4753_s7 + $0x58] sm:$0xff] }
 0x190   : > { %v713_v33 = vmax.f32 %v681_v29, %v683_v22  ;;  %v739_v22 = vld [vmem:[%s4753_s7 + $0xc0] sm:$0xff] }
 0x191   : > { %v578_v6 = vpop.f32.mrf.mxu0  ;;  %v743_v29 = vld [vmem:[%s4753_s7 + $0xe0] sm:$0xff] }
 0x192   : > { %v616_v10 = vmul.f32 %v3600_v17, %v578_v6  ;;  %v719_v17 = vld [vmem:[%s4753_s7 + $0x20] sm:$0xff] }
 0x193   : > { %848 = vmatmul.f32.gmra.mxu1 %v719_v17  ;;  %v727_v6 = vld [vmem:[%s4753_s7 + $0x60] sm:$0xff] }
 0x194   : > { %v652_v14 = vadd.f32 %v3606_v19, %v616_v10  ;;  %v702_v19 = vmax.f32 %v670_v24, %v672_v0  ;;  %v725_v24 = vld [vmem:[%s4753_s7 + $0x50] sm:$0xff]  ;;  %v731_v10 = vld [vmem:[%s4753_s7 + $0x80] sm:$0xff]  ;;  %v3171_v0 = vld [vmem:[%s4753_s7 + $0x168] sm:$0xff] }
 0x196   : > { %v684_v21 = vmax.f32 %v652_v14, 0.0  ;;  %v730_v14 = vld [vmem:[%s4753_s7 + $0x78] sm:$0xff] }
 0x198   : > { %v3751_v27 = vmax.f32 %v682_v20, %v684_v21  ;;  %v737_v20 = vld [vmem:[%s4753_s7 + $0xb0] sm:$0xff]  ;;  %v734_v21 = vld [vmem:[%s4753_s7 + $0x98] sm:$0xff] }
 0x19a   : > { %911 = vmatpush.msrb.mxu2 %v3751_v27 }
 0x19b   : > { %851 = vmatmul.f32.gmra.mxu1 %v721_v4  ;;  %v3190_v4 = vld [vmem:[%s4753_s7 + $0x200] sm:$0xff] }
 0x19c   : > { %912 = vmatpush.msrb.mxu2 %v713_v33 }
 0x19e   : > { %913 = vmatpush.msrb.mxu2 %v712_v39 }
 0x1a0   : > { %914 = vmatpush.msrb.mxu2 %v711_v44 }
 0x1a2   : > { %915 = vmatpush.msrb.mxu2 %v710_v53 }
 0x1a3   : > { %854 = vmatmul.f32.gmra.mxu1 %v723_v18 }
 0x1a4   : > { %916 = vmatpush.msrb.mxu2 %v709_v60 }
 0x1a6   : > { %917 = vmatpush.msrb.mxu2 %v708_v51 }
 0x1a8   : > { %918 = vmatpush.msrb.mxu2 %v707_v41 }
 0x1aa   : > { %919 = vmatpush.msrb.mxu2 %v706_v57 }
 0x1ab   : > { %857 = vmatmul.f32.gmra.mxu1 %v725_v24  ;;  %v3179_v24 = vld [vmem:[%s4753_s7 + $0x1a8] sm:$0xff] }
 0x1ac   : > { %920 = vmatpush.msrb.mxu2 %v705_v63 }
 0x1ae   : > { %921 = vmatpush.msrb.mxu2 %v704_v30 }
 0x1b0   : > { %922 = vmatpush.msrb.mxu2 %v703_v1 }
 0x1b2   : > { %923 = vmatpush.msrb.mxu2 %v702_v19 }
 0x1b3   : > { %860 = vmatmul.f32.gmra.mxu1 %v727_v6  ;;  %v3194_v6 = vld [vmem:[%s4753_s7 + $0x220] sm:$0xff] }
 0x1b4   : > { %924 = vmatpush.msrb.mxu2 %v701_v2 }
 0x1b5   : > { %3148 = vmatmul.msk.f32.vlgmr.msrb.gmra.mxu2 %vm759_vm2, %v716_v3 }
 0x1b6   : > { %1188 = vmatpush.msra.mxu2 %v3751_v27  ;;  %v738_v27 = vld [vmem:[%s4753_s7 + $0xb8] sm:$0xff] }
 0x1b8   : > { %1189 = vmatpush.msra.mxu2 %v713_v33  ;;  %v745_v33 = vld [vmem:[%s4753_s7 + $0xf0] sm:$0xff] }
 0x1ba   : > { %1190 = vmatpush.msra.mxu2 %v712_v39  ;;  %v749_v39 = vld [vmem:[%s4753_s7 + $0x110] sm:$0xff] }
 0x1bb   : > { %863 = vmatmul.f32.gmra.mxu1 %v729_v8 }
 0x1bc   : > { %1191 = vmatpush.msra.mxu2 %v711_v44  ;;  %v748_v44 = vld [vmem:[%s4753_s7 + $0x108] sm:$0xff] }
 0x1bd   : > { %3149 = vmatmul.msk.f32.gmra.mxu2 %vm759_vm2, %v718_v13  ;;  %v3177_v13 = vld [vmem:[%s4753_s7 + $0x198] sm:$0xff] }
 0x1be   : > { %1192 = vmatpush.msra.mxu2 %v710_v53  ;;  %v752_v53 = vld [vmem:[%s4753_s7 + $0x128] sm:$0xff] }
 0x1c0   : > { %1193 = vmatpush.msra.mxu2 %v709_v60  ;;  %v754_v60 = vld [vmem:[%s4753_s7 + $0x138] sm:$0xff] }
 0x1c2   : > { %1194 = vmatpush.msra.mxu2 %v708_v51  ;;  %v756_v51 = vld [vmem:[%s4753_s7 + $0x148] sm:$0xff] }
 0x1c3   : > { %866 = vmatmul.f32.gmra.mxu1 %v731_v10  ;;  %v3183_v10 = vld [vmem:[%s4753_s7 + $0x1c8] sm:$0xff] }
 0x1c4   : > { %1195 = vmatpush.msra.mxu2 %v707_v41  ;;  %v3174_v41 = vld [vmem:[%s4753_s7 + $0x180] sm:$0xff] }
 0x1c5   : > { %3150 = vmatmul.msk.f32.gmra.mxu2 %vm759_vm2, %v720_v23  ;;  %1125 = vmatmul.f32.gmra.mxu0 %v3174_v41  ;;  %v3192_v23 = vld [vmem:[%s4753_s7 + $0x210] sm:$0xff] }
 0x1c6   : > { %1196 = vmatpush.msra.mxu2 %v706_v57  ;;  %v3269_v41 = vld [vmem:[%s4750_s4 + $0x10] sm:$0xff] }
 0x1c7   : > { %1720 = vmatpush.msra.mxu0 %v3269_v41 }
 0x1c8   : > { %1197 = vmatpush.msra.mxu2 %v705_v63  ;;  %v3184_v63 = vld [vmem:[%s4753_s7 + $0x1d0] sm:$0xff] }
 0x1c9   : > { %1140 = vmatmul.f32.gmra.mxu3 %v3184_v63 }
 0x1ca   : > { %1198 = vmatpush.msra.mxu2 %v704_v30  ;;  %v3186_v30 = vld [vmem:[%s4753_s7 + $0x1e0] sm:$0xff] }
 0x1cb   : > { %869 = vmatmul.f32.gmra.mxu1 %v733_v12  ;;  %v3198_v12 = vld [vmem:[%s4753_s7 + $0x240] sm:$0xff] }
 0x1cc   : > { %1199 = vmatpush.msra.mxu2 %v703_v1 }
 0x1cd   : > { %3151 = vmatmul.msk.f32.gmra.mxu2 %vm759_vm2, %v722_v5  ;;  %v3870_v31 = vpop.f32.mrf.mxu2  ;;  %1128 = vmatmul.f32.gmra.mxu0 %v3176_v35  ;;  %v1120_v35 = vpop.f32.mrf.mxu0 }
 0x1ce   : > { %1200 = vmatpush.msra.mxu2 %v702_v19  ;;  %v3188_v19 = vld [vmem:[%s4753_s7 + $0x1f0] sm:$0xff] }
 0x1d0   : > { %1201 = vmatpush.msra.mxu2 %v701_v2  ;;  %v3175_v2 = vld [vmem:[%s4753_s7 + $0x188] sm:$0xff] }
 0x1d1   : > { %1143 = vmatmul.f32.gmra.mxu3 %v3186_v30  ;;  %v3303_v30 = vld [vmem:[%s4750_s4 + $0x20] sm:$0xff] }
 0x1d2   : > { %2078 = vmatpush.msra.mxu3 %v3303_v30 }
 0x1d3   : > { %872 = vmatmul.f32.gmra.mxu1 %v735_v15 }
 0x1d5   : > { %3152 = vmatmul.msk.f32.gmra.mxu2 %vm759_vm2, %v724_v7  ;;  %v3882_v36 = vpop.f32.mrf.mxu2  ;;  %v3181_v7 = vld [vmem:[%s4753_s7 + $0x1b8] sm:$0xff] }
 0x1d9   : > { %1146 = vmatmul.f32.gmra.mxu3 %v3188_v19 }
 0x1db   : > { %875 = vmatmul.f32.gmra.mxu1 %v737_v20  ;;  %v3187_v20 = vld [vmem:[%s4753_s7 + $0x1e8] sm:$0xff] }
 0x1dd   : > { %3153 = vmatmul.msk.f32.gmra.mxu2 %vm759_vm2, %v726_v9  ;;  %v3894_v40 = vpop.f32.mrf.mxu2  ;;  %v3196_v9 = vld [vmem:[%s4753_s7 + $0x230] sm:$0xff] }
 0x1e1   : > { %1149 = vmatmul.f32.gmra.mxu3 %v3190_v4 }
 0x1e3   : > { %878 = vmatmul.f32.gmra.mxu1 %v739_v22  ;;  %v3202_v22 = vld [vmem:[%s4753_s7 + $0x260] sm:$0xff] }
 0x1e5   : > { %3154 = vmatmul.msk.f32.gmra.mxu2 %vm759_vm2, %v728_v11  ;;  %v906_v43 = vpop.f32.mrf.mxu2 }
 0x1e9   : > { %1152 = vmatmul.f32.gmra.mxu3 %v3192_v23  ;;  %v3205_v23 = vld [vmem:[%s4753_s7 + $0x278] sm:$0xff] }
 0x1eb   : > { %881 = vmatmul.f32.gmra.mxu1 %v741_v26 }
 0x1ed   : > { %3155 = vmatmul.msk.f32.gmra.mxu2 %vm759_vm2, %v730_v14  ;;  %v3185_v14 = vld [vmem:[%s4753_s7 + $0x1d8] sm:$0xff] }
 0x1ee   : > { %v4088_v58 = vpop.f32.mrf.mxu3 }
 0x1f1   : > { %1155 = vmatmul.f32.gmra.mxu3 %v3194_v6 }
 0x1f3   : > { %884 = vmatmul.f32.gmra.mxu1 %v743_v29  ;;  %v3191_v29 = vld [vmem:[%s4753_s7 + $0x208] sm:$0xff] }
 0x1f5   : > { %3156 = vmatmul.msk.f32.gmra.mxu2 %vm759_vm2, %v732_v16  ;;  %v3200_v16 = vld [vmem:[%s4753_s7 + $0x250] sm:$0xff] }
 0x1f9   : > { %1158 = vmatmul.f32.gmra.mxu3 %v3196_v9 }
 0x1fb   : > { %887 = vmatmul.f32.gmra.mxu1 %v745_v33  ;;  %v3206_v33 = vld [vmem:[%s4753_s7 + $0x280] sm:$0xff] }
 0x1fd   : > { %3157 = vmatmul.msk.f32.gmra.mxu2 %vm759_vm2, %v734_v21 }
 0x1fe   : > { %v4099_v46 = vpop.f32.mrf.mxu3 }
 0x201   : > { %1161 = vmatmul.f32.gmra.mxu3 %v3198_v12 }
 0x203   : > { %890 = vmatmul.f32.gmra.mxu1 %v747_v37  ;;  %v843_v37 = vpop.f32.mrf.mxu1 }
 0x205   : > { %3158 = vmatmul.msk.f32.gmra.mxu2 %vm759_vm2, %v736_v25  ;;  %v3189_v25 = vld [vmem:[%s4753_s7 + $0x1f8] sm:$0xff] }
 0x208   : > { %v4110_v63 = vpop.f32.mrf.mxu3 }
 0x209   : > { %1164 = vmatmul.f32.gmra.mxu3 %v3200_v16 }
 0x20b   : > { %893 = vmatmul.f32.gmra.mxu1 %v749_v39  ;;  %v3208_v39 = vld [vmem:[%s4753_s7 + $0x290] sm:$0xff] }
 0x20d   : > { %3159 = vmatmul.msk.f32.gmra.mxu2 %vm759_vm2, %v738_v27  ;;  %v3204_v27 = vld [vmem:[%s4753_s7 + $0x270] sm:$0xff] }
 0x211   : > { %1167 = vmatmul.f32.gmra.mxu3 %v3202_v22 }
 0x215   : > { %3160 = vmatmul.msk.f32.gmra.mxu2 %vm759_vm2, %v740_v32 }
 0x219   : > { %1170 = vmatmul.f32.gmra.mxu3 %v3204_v27 }
 0x21d   : > { %3161 = vmatmul.msk.f32.gmra.mxu2 %vm759_vm2, %v742_v34  ;;  %v3193_v34 = vld [vmem:[%s4753_s7 + $0x218] sm:$0xff] }
 0x221   : > { %1173 = vmatmul.f32.gmra.mxu3 %v3206_v33 }
 0x225   : > { %3162 = vmatmul.msk.f32.gmra.mxu2 %vm759_vm2, %v744_v38 }
 0x229   : > { %1176 = vmatmul.f32.gmra.mxu3 %v3208_v39 }
 0x22d   : > { %3163 = vmatmul.msk.f32.gmra.mxu2 %vm759_vm2, %v746_v42  ;;  %v3195_v42 = vld [vmem:[%s4753_s7 + $0x228] sm:$0xff] }
 0x235   : > { %3164 = vmatmul.msk.f32.gmra.mxu2 %vm759_vm2, %v748_v44  ;;  %v846_v44 = vpop.f32.mrf.mxu1 }
 0x238   : > { %v3905_v45 = vpop.f32.mrf.mxu2 }
 0x239   : > { %v927_v4 = vadd.f32 %v3905_v45, %v843_v37  ;;  %v3207_v45 = vld [vmem:[%s4753_s7 + $0x288] sm:$0xff] }
 0x23d   : > { %3165 = vmatmul.msk.f32.gmra.mxu2 %vm759_vm2, %v750_v47  ;;  %v3197_v47 = vld [vmem:[%s4753_s7 + $0x238] sm:$0xff]  ;;  %v849_v50 = vpop.f32.mrf.mxu1 }
 0x240   : > { %v3911_v49 = vpop.f32.mrf.mxu2 }
 0x245   : > { %3166 = vmatmul.msk.f32.gmra.mxu2 %vm759_vm2, %v752_v53  ;;  %v3210_v53 = vld [vmem:[%s4753_s7 + $0x2a0] sm:$0xff]  ;;  %v852_v55 = vpop.f32.mrf.mxu1 }
 0x246   : > { %1179 = vmatmul.f32.gmra.mxu3 %v3210_v53 }
 0x248   : > { %v3917_v54 = vpop.f32.mrf.mxu2 }
 0x24d   : > { %3167 = vmatmul.msk.f32.gmra.mxu2 %vm759_vm2, %v754_v60  ;;  %v3199_v60 = vld [vmem:[%s4753_s7 + $0x248] sm:$0xff]  ;;  %v855_v19 = vpop.f32.mrf.mxu1 }
 0x24e   : > { %1182 = vmatmul.f32.gmra.mxu3 %v3212_v61 }
 0x250   : > { %v3929_v62 = vpop.f32.mrf.mxu2 }
 0x255   : > { %3168 = vmatmul.msk.f32.gmra.mxu2 %vm759_vm2, %v756_v51 }
 0x258   : > { %v3947_v48 = vpop.f32.mrf.mxu2 }
 0x25d   : > { %3169 = vmatmul.msk.f32.gmra.mxu2 %vm759_vm2, %v758_v56 }
 0x260   : > { %v3959_v57 = vpop.f32.mrf.mxu2 }
 0x265   : > { %3214 = vmatmul.msk.f32.vlgmr.msra.gmra.mxu2 %vm759_vm2, %v3171_v0  ;;  %v3203_v0 = vld [vmem:[%s4753_s7 + $0x268] sm:$0xff] }
 0x268   : > { %v3971_v17 = vpop.f32.mrf.mxu2 }
 0x26d   : > { %3215 = vmatmul.msk.f32.gmra.mxu2 %vm759_vm2, %v3173_v28  ;;  %v3286_v28 = vld [vmem:[%s4750_s4 + $0x18] sm:$0xff] }
 0x26e   : > { %1899 = vmatpush.msra.mxu1 %v3286_v28 }
 0x270   : > { %v3980_v1 = vpop.f32.mrf.mxu2 }
 0x275   : > { %3216 = vmatmul.msk.f32.gmra.mxu2 %vm759_vm2, %v3175_v2 }
 0x278   : > { %v3989_v3 = vpop.f32.mrf.mxu2 }
 0x27d   : > { %3217 = vmatmul.msk.f32.gmra.mxu2 %vm759_vm2, %v3177_v13 }
 0x280   : > { %v3998_v18 = vpop.f32.mrf.mxu2 }
 0x285   : > { %3218 = vmatmul.msk.f32.gmra.mxu2 %vm759_vm2, %v3179_v24  ;;  %v1123_v24 = vpop.f32.mrf.mxu0 }
 0x288   : > { %v4007_v5 = vpop.f32.mrf.mxu2 }
 0x28d   : > { %3219 = vmatmul.msk.f32.gmra.mxu2 %vm759_vm2, %v3181_v7  ;;  %v4126_v7 = vpop.f32.mrf.mxu3  ;;  %v1126_v22 = vpop.f32.mrf.mxu0 }
 0x290   : > { %v4016_v8 = vpop.f32.mrf.mxu2 }
 0x295   : > { %3220 = vmatmul.msk.f32.gmra.mxu2 %vm759_vm2, %v3183_v10  ;;  %v930_v10 = vadd.f32 %v3911_v49, %v846_v44  ;;  %v4140_v49 = vpop.f32.mrf.mxu3 }
 0x298   : > { %v4025_v11 = vpop.f32.mrf.mxu2 }
 0x29d   : > { %3221 = vmatmul.msk.f32.gmra.mxu2 %vm759_vm2, %v3185_v14  ;;  %v858_v14 = vpop.f32.mrf.mxu1  ;;  %v4151_v53 = vpop.f32.mrf.mxu3 }
 0x2a0   : > { %v4034_v15 = vpop.f32.mrf.mxu2 }
 0x2a5   : > { %3222 = vmatmul.msk.f32.gmra.mxu2 %vm759_vm2, %v3187_v20  ;;  %v861_v39 = vpop.f32.mrf.mxu1 }
 0x2a8   : > { %v4043_v21 = vpop.f32.mrf.mxu2 }
 0x2ad   : > { %3223 = vmatmul.msk.f32.gmra.mxu2 %vm759_vm2, %v3189_v25  ;;  %v3320_v25 = vld [vmem:[%s4750_s4 + $0x28] sm:$0xff]  ;;  %v864_v30 = vpop.f32.mrf.mxu1 }
 0x2ae   : > { %2257 = vmatpush.msrb.mxu2 %v3320_v25 }
 0x2b0   : > { %v4052_v26 = vpop.f32.mrf.mxu2 }
 0x2b5   : > { %3224 = vmatmul.msk.f32.gmra.mxu2 %vm759_vm2, %v3191_v29  ;;  %v933_v29 = vadd.f32 %v3917_v54, %v849_v50  ;;  %v1129_v54 = vpop.f32.mrf.mxu0  ;;  %v936_v50 = vadd.f32 %v3929_v62, %v852_v55  ;;  %v939_v55 = vadd.f32 %v3947_v48, %v855_v19  ;;  %v867_v48 = vpop.f32.mrf.mxu1  ;;  %v942_v19 = vadd.f32 %v3959_v57, %v858_v14 }
 0x2b8   : > { %v4061_v32 = vpop.f32.mrf.mxu2 }
 0x2bd   : > { %3225 = vmatmul.msk.f32.gmra.mxu2 %vm759_vm2, %v3193_v34  ;;  %v3209_v34 = vld [vmem:[%s4753_s7 + $0x298] sm:$0xff] }
 0x2c0   : > { %v4070_v38 = vpop.f32.mrf.mxu2 }
 0x2c5   : > { %3226 = vmatmul.msk.f32.gmra.mxu2 %vm759_vm2, %v3195_v42 }
 0x2c8   : > { %v4079_v43 = vpop.f32.mrf.mxu2 }
 0x2cd   : > { %3227 = vmatmul.msk.f32.gmra.mxu2 %vm759_vm2, %v3197_v47 }
 0x2d0   : > { %v4090_v59 = vpop.f32.mrf.mxu2 }
 0x2d5   : > { %3228 = vmatmul.msk.f32.gmra.mxu2 %vm759_vm2, %v3199_v60 }
 0x2d8   : > { %v4101_v51 = vpop.f32.mrf.mxu2 }
 0x2dd   : > { %3229 = vmatmul.msk.f32.gmra.mxu2 %vm759_vm2, %v3201_v52  ;;  %v3211_v52 = vld [vmem:[%s4753_s7 + $0x2a8] sm:$0xff] }
 0x2e0   : > { %v989_v56 = vpop.f32.mrf.mxu2 }
 0x2e5   : > { %3230 = vmatmul.msk.f32.gmra.mxu2 %vm759_vm2, %v3203_v0 }
 0x2e8   : > { %v1203_v2 = vpop.f32.mrf.mxu2 }
 0x2e9   : > { %v1204_v13 = vadd.f32 %v1203_v2, %v1120_v35  ;;  %v4167_v2 = vpop.f32.mrf.mxu3 }
 0x2eb   : > { %v1269_v6 = vmax.f32 %v927_v4, %v1204_v13  ;;  %v3213_v4 = vld [vmem:[%s4753_s7 + $0x2b8] sm:$0xff] }
 0x2ed   : > { %1292 = vst.msk [vmem:[#allocation2] sm:$0xff] %vm1291_vm3, %v1269_v6  ;;  %3231 = vmatmul.msk.f32.gmra.mxu2 %vm759_vm2, %v3205_v23 }
 0x2f0   : > { %v1206_v9 = vpop.f32.mrf.mxu2 }
 0x2f1   : > { %v1207_v12 = vadd.f32 %v1206_v9, %v1123_v24 }
 0x2f3   : > { %v1270_v16 = vmax.f32 %v930_v10, %v1207_v12  ;;  %v4185_v12 = vpop.f32.mrf.mxu3 }
 0x2f4   : > { %v1314_v20 = vld [vmem:[#allocation2] sm:$0xff] }
 0x2f5   : > { %1293 = vst.msk [vmem:[#allocation2 + $0x8] sm:$0xff] %vm1291_vm3, %v1270_v16  ;;  %3232 = vmatmul.msk.f32.gmra.mxu2 %vm759_vm2, %v3207_v45  ;;  %3236 = vmatmul.msk.f32.vlgmr.msrb.gmra.mxu1 %vm1291_vm3, %v1314_v20 }
 0x2f8   : > { %v1209_v27 = vpop.f32.mrf.mxu2 }
 0x2f9   : > { %v1210_v33 = vadd.f32 %v1209_v27, %v1126_v22  ;;  %v870_v22 = vpop.f32.mrf.mxu1 }
 0x2fb   : > { %v1271_v37 = vmax.f32 %v933_v29, %v1210_v33 }
 0x2fc   : > { %v1315_v42 = vld [vmem:[#allocation2 + $0x8] sm:$0xff] }
 0x2fd   : > { %v1460_v44 = vld [vmem:[#allocation2 + $0x1] sm:$0xff]  ;;  %1294 = vst.msk [vmem:[#allocation2 + $0x10] sm:$0xff] %vm1291_vm3, %v1271_v37  ;;  %3233 = vmatmul.msk.f32.gmra.mxu2 %vm759_vm2, %v3209_v34  ;;  %3237 = vmatmul.msk.f32.gmra.mxu1 %vm1291_vm3, %v1315_v42  ;;  %v4210_v34 = vpop.f32.mrf.mxu3 }
 0x2fe   : > { %v1639_v47 = vld [vmem:[#allocation2 + $0x2] sm:$0xff]  ;;  %3253 = vmatmul.msk.f32.vlgmr.msrb.gmra.mxu3 %vm1291_vm3, %v1460_v44 }
 0x2ff   : > { %3270 = vmatmul.msk.f32.vlgmr.msra.gmra.mxu0 %vm1291_vm3, %v1639_v47 }
 0x300   : > { %v1212_v60 = vpop.f32.mrf.mxu2 }
 0x301   : > { %v1213_v61 = vadd.f32 %v1212_v60, %v1129_v54  ;;  %v873_v42 = vpop.f32.mrf.mxu1  ;;  %v951_v60 = vadd.f32 %v3989_v3, %v867_v48 }
 0x303   : > { %v1272_v41 = vmax.f32 %v936_v50, %v1213_v61 }
 0x304   : > { %v4157_v56 = vld [vmem:[#allocation2 + $0x10] sm:$0xff] }
 0x305   : > { %v1461_v35 = vld [vmem:[#allocation2 + $0x9] sm:$0xff]  ;;  %1295 = vst.msk [vmem:[#allocation2 + $0x18] sm:$0xff] %vm1291_vm3, %v1272_v41  ;;  %3234 = vmatmul.msk.f32.gmra.mxu2 %vm759_vm2, %v3211_v52  ;;  %3238 = vmatmul.msk.f32.gmra.mxu1 %vm1291_vm3, %v4157_v56 }
 0x306   : > { %v1640_v0 = vld [vmem:[#allocation2 + $0xa] sm:$0xff]  ;;  %3254 = vmatmul.msk.f32.gmra.mxu3 %vm1291_vm3, %v1461_v35 }
 0x307   : > { %3271 = vmatmul.msk.f32.gmra.mxu0 %vm1291_vm3, %v1640_v0 }
 0x308   : > { %v1215_v62 = vpop.f32.mrf.mxu2 }
 0x309   : > { %v1216_v28 = vadd.f32 %v1215_v62, %v4088_v58  ;;  %v876_v0 = vpop.f32.mrf.mxu1 }
 0x30b   : > { %v1273_v13 = vmax.f32 %v939_v55, %v1216_v28 }
 0x30c   : > { %v4172_v23 = vld [vmem:[#allocation2 + $0x18] sm:$0xff] }
 0x30d   : > { %v4174_v24 = vld [vmem:[#allocation2 + $0x11] sm:$0xff]  ;;  %1296 = vst.msk [vmem:[#allocation2 + $0x20] sm:$0xff] %vm1291_vm3, %v1273_v13  ;;  %3235 = vmatmul.msk.f32.gmra.mxu2 %vm759_vm2, %v3213_v4  ;;  %3239 = vmatmul.msk.f32.gmra.mxu1 %vm1291_vm3, %v4172_v23 }
 0x30e   : > { %v1641_v6 = vld [vmem:[#allocation2 + $0x12] sm:$0xff]  ;;  %3255 = vmatmul.msk.f32.gmra.mxu3 %vm1291_vm3, %v4174_v24 }
 0x30f   : > { %3272 = vmatmul.msk.f32.gmra.mxu0 %vm1291_vm3, %v1641_v6 }
 0x310   : > { %v1218_v58 = vpop.f32.mrf.mxu2 }
 0x311   : > { %v1219_v9 = vadd.f32 %v1218_v58, %v4099_v46  ;;  %v945_v46 = vadd.f32 %v3971_v17, %v861_v39 }
 0x313   : > { %v1274_v10 = vmax.f32 %v942_v19, %v1219_v9 }
 0x314   : > { %v4187_v45 = vld [vmem:[#allocation2 + $0x20] sm:$0xff] }
 0x315   : > { %v4189_v16 = vld [vmem:[#allocation2 + $0x19] sm:$0xff]  ;;  %1297 = vst.msk [vmem:[#allocation2 + $0x28] sm:$0xff] %vm1291_vm3, %v1274_v10  ;;  %3240 = vmatmul.msk.f32.gmra.mxu1 %vm1291_vm3, %v4187_v45  ;;  %3321 = vmatmul.msk.f32.vlgmr.msrb.gmra.mxu2 %vm1291_vm3, %v1641_v6  ;;  %v957_v6 = vadd.f32 %v4007_v5, %v873_v42 }
 0x316   : > { %v1642_v20 = vld [vmem:[#allocation2 + $0x1a] sm:$0xff]  ;;  %3256 = vmatmul.msk.f32.gmra.mxu3 %vm1291_vm3, %v4189_v16 }
 0x317   : > { %3273 = vmatmul.msk.f32.gmra.mxu0 %vm1291_vm3, %v1642_v20 }
 0x318   : > { %v1221_v57 = vpop.f32.mrf.mxu2 }
 0x319   : > { %v1222_v14 = vadd.f32 %v1221_v57, %v4110_v63  ;;  %v948_v63 = vadd.f32 %v3980_v1, %v864_v30  ;;  %v4233_v1 = vpop.f32.mrf.mxu3 }
 0x31b   : > { %v1275_v25 = vmax.f32 %v945_v46, %v1222_v14 }
 0x31c   : > { %v4200_v27 = vld [vmem:[#allocation2 + $0x28] sm:$0xff] }
 0x31d   : > { %v4202_v29 = vld [vmem:[#allocation2 + $0x21] sm:$0xff]  ;;  %1298 = vst.msk [vmem:[#allocation2 + $0x30] sm:$0xff] %vm1291_vm3, %v1275_v25  ;;  %3241 = vmatmul.msk.f32.gmra.mxu1 %vm1291_vm3, %v4200_v27  ;;  %3322 = vmatmul.msk.f32.gmra.mxu2 %vm1291_vm3, %v1642_v20 }
 0x31e   : > { %v4204_v33 = vld [vmem:[#allocation2 + $0x22] sm:$0xff]  ;;  %3257 = vmatmul.msk.f32.gmra.mxu3 %vm1291_vm3, %v4202_v29 }
 0x31f   : > { %3274 = vmatmul.msk.f32.gmra.mxu0 %vm1291_vm3, %v4204_v33 }
 0x320   : > { %v1224_v17 = vpop.f32.mrf.mxu2 }
 0x321   : > { %v1225_v37 = vadd.f32 %v1224_v17, %v4126_v7  ;;  %v4254_v62 = vpop.f32.mrf.mxu3 }
 0x323   : > { %v1276_v39 = vmax.f32 %v948_v63, %v1225_v37 }
 0x324   : > { %v4218_v44 = vld [vmem:[#allocation2 + $0x30] sm:$0xff] }
 0x325   : > { %v4220_v47 = vld [vmem:[#allocation2 + $0x29] sm:$0xff]  ;;  %1299 = vst.msk [vmem:[#allocation2 + $0x38] sm:$0xff] %vm1291_vm3, %v1276_v39  ;;  %3242 = vmatmul.msk.f32.gmra.mxu1 %vm1291_vm3, %v4218_v44  ;;  %3323 = vmatmul.msk.f32.gmra.mxu2 %vm1291_vm3, %v4204_v33 }
 0x326   : > { %v4222_v54 = vld [vmem:[#allocation2 + $0x2a] sm:$0xff]  ;;  %3258 = vmatmul.msk.f32.gmra.mxu3 %vm1291_vm3, %v4220_v47 }
 0x327   : > { %3275 = vmatmul.msk.f32.gmra.mxu0 %vm1291_vm3, %v4222_v54 }
 0x328   : > { %v1227_v7 = vpop.f32.mrf.mxu2 }
 0x329   : > { %v1228_v50 = vadd.f32 %v1227_v7, %v4140_v49  ;;  %v954_v49 = vadd.f32 %v3998_v18, %v870_v22  ;;  %v879_v18 = vpop.f32.mrf.mxu1  ;;  %v4273_v19 = vpop.f32.mrf.mxu3 }
 0x32b   : > { %v1277_v61 = vmax.f32 %v951_v60, %v1228_v50 }
 0x32c   : > { %v4237_v52 = vld [vmem:[#allocation2 + $0x38] sm:$0xff] }
 0x32d   : > { %v4239_v41 = vld [vmem:[#allocation2 + $0x31] sm:$0xff]  ;;  %1300 = vst.msk [vmem:[#allocation2 + $0x40] sm:$0xff] %vm1291_vm3, %v1277_v61  ;;  %3243 = vmatmul.msk.f32.gmra.mxu1 %vm1291_vm3, %v4237_v52  ;;  %3324 = vmatmul.msk.f32.gmra.mxu2 %vm1291_vm3, %v4222_v54 }
 0x32e   : > { %v4241_v35 = vld [vmem:[#allocation2 + $0x32] sm:$0xff]  ;;  %3259 = vmatmul.msk.f32.gmra.mxu3 %vm1291_vm3, %v4239_v41 }
 0x32f   : > { %3276 = vmatmul.msk.f32.gmra.mxu0 %vm1291_vm3, %v4241_v35 }
 0x330   : > { %v1230_v3 = vpop.f32.mrf.mxu2 }
 0x331   : > { %v1231_v30 = vadd.f32 %v1230_v3, %v4151_v53  ;;  %v882_v46 = vpop.f32.mrf.mxu1  ;;  %v4303_v63 = vpop.f32.mrf.mxu3 }
 0x332   : > { %v966_v61 = vadd.f32 %v4034_v15, %v882_v46 }
 0x333   : > { %v1278_v55 = vmax.f32 %v954_v49, %v1231_v30 }
 0x334   : > { %v4256_v28 = vld [vmem:[#allocation2 + $0x40] sm:$0xff] }
 0x335   : > { %v4258_v4 = vld [vmem:[#allocation2 + $0x39] sm:$0xff]  ;;  %1301 = vst.msk [vmem:[#allocation2 + $0x48] sm:$0xff] %vm1291_vm3, %v1278_v55  ;;  %3244 = vmatmul.msk.f32.gmra.mxu1 %vm1291_vm3, %v4256_v28  ;;  %3325 = vmatmul.msk.f32.gmra.mxu2 %vm1291_vm3, %v4241_v35 }
 0x336   : > { %v4260_v13 = vld [vmem:[#allocation2 + $0x3a] sm:$0xff]  ;;  %3260 = vmatmul.msk.f32.gmra.mxu3 %vm1291_vm3, %v4258_v4 }
 0x337   : > { %3277 = vmatmul.msk.f32.gmra.mxu0 %vm1291_vm3, %v4260_v13 }
 0x338   : > { %v1233_v53 = vpop.f32.mrf.mxu2 }
 0x339   : > { %v1234_v48 = vadd.f32 %v1233_v53, %v4167_v2  ;;  %v960_v2 = vadd.f32 %v4016_v8, %v876_v0  ;;  %v885_v42 = vpop.f32.mrf.mxu1 }
 0x33b   : > { %v1279_v58 = vmax.f32 %v957_v6, %v1234_v48 }
 0x33c   : > { %v4275_v9 = vld [vmem:[#allocation2 + $0x48] sm:$0xff] }
 0x33d   : > { %v4277_v10 = vld [vmem:[#allocation2 + $0x41] sm:$0xff]  ;;  %1302 = vst.msk [vmem:[#allocation2 + $0x50] sm:$0xff] %vm1291_vm3, %v1279_v58  ;;  %3245 = vmatmul.msk.f32.gmra.mxu1 %vm1291_vm3, %v4275_v9  ;;  %3326 = vmatmul.msk.f32.gmra.mxu2 %vm1291_vm3, %v4260_v13 }
 0x33e   : > { %v4279_v20 = vld [vmem:[#allocation2 + $0x42] sm:$0xff]  ;;  %3261 = vmatmul.msk.f32.gmra.mxu3 %vm1291_vm3, %v4277_v10 }
 0x33f   : > { %3278 = vmatmul.msk.f32.gmra.mxu0 %vm1291_vm3, %v4279_v20 }
 0x340   : > { %v1236_v5 = vpop.f32.mrf.mxu2 }
 0x341   : > { %v1237_v57 = vadd.f32 %v1236_v5, %v4185_v12  ;;  %v963_v12 = vadd.f32 %v4025_v11, %v879_v18  ;;  %v4326_v11 = vpop.f32.mrf.mxu3  ;;  %v888_v18 = vpop.f32.mrf.mxu1 }
 0x342   : > { %v972_v46 = vadd.f32 %v4052_v26, %v888_v18  ;;  %v3371_v26 = vld [vmem:[%s4750_s4 + $0x40] sm:$0xff] }
 0x343   : > { %v1280_v14 = vmax.f32 %v960_v2, %v1237_v57  ;;  %2794 = vmatpush.msrb.mxu3 %v3371_v26 }
 0x344   : > { %v4292_v22 = vld [vmem:[#allocation2 + $0x50] sm:$0xff] }
 0x345   : > { %v4294_v25 = vld [vmem:[#allocation2 + $0x49] sm:$0xff]  ;;  %1303 = vst.msk [vmem:[#allocation2 + $0x58] sm:$0xff] %vm1291_vm3, %v1280_v14  ;;  %3246 = vmatmul.msk.f32.gmra.mxu1 %vm1291_vm3, %v4292_v22  ;;  %3327 = vmatmul.msk.f32.gmra.mxu2 %vm1291_vm3, %v4279_v20 }
 0x346   : > { %v4296_v17 = vld [vmem:[#allocation2 + $0x4a] sm:$0xff]  ;;  %3262 = vmatmul.msk.f32.gmra.mxu3 %vm1291_vm3, %v4294_v25 }
 0x347   : > { %3279 = vmatmul.msk.f32.gmra.mxu0 %vm1291_vm3, %v4296_v17 }
 0x348   : > { %v1239_v8 = vpop.f32.mrf.mxu2 }
 0x349   : > { %v1240_v37 = vadd.f32 %v1239_v8, %v4210_v34  ;;  %v1174_v6 = vpop.f32.mrf.mxu3 }
 0x34b   : > { %v1281_v39 = vmax.f32 %v963_v12, %v1240_v37 }
 0x34c   : > { %v4311_v7 = vld [vmem:[#allocation2 + $0x58] sm:$0xff] }
 0x34d   : > { %v4313_v60 = vld [vmem:[#allocation2 + $0x51] sm:$0xff]  ;;  %1304 = vst.msk [vmem:[#allocation2 + $0x60] sm:$0xff] %vm1291_vm3, %v1281_v39  ;;  %3247 = vmatmul.msk.f32.gmra.mxu1 %vm1291_vm3, %v4311_v7  ;;  %3328 = vmatmul.msk.f32.gmra.mxu2 %vm1291_vm3, %v4296_v17 }
 0x34e   : > { %v4315_v50 = vld [vmem:[#allocation2 + $0x52] sm:$0xff]  ;;  %3263 = vmatmul.msk.f32.gmra.mxu3 %vm1291_vm3, %v4313_v60 }
 0x34f   : > { %3280 = vmatmul.msk.f32.gmra.mxu0 %vm1291_vm3, %v4315_v50 }
 0x350   : > { %v1242_v34 = vpop.f32.mrf.mxu2 }
 0x351   : > { %v1243_v0 = vadd.f32 %v1242_v34, %v4233_v1  ;;  %v969_v1 = vadd.f32 %v4043_v21, %v885_v42  ;;  %v3337_v21 = vld [vmem:[%s4750_s4 + $0x30] sm:$0xff]  ;;  %v1177_v12 = vpop.f32.mrf.mxu3 }
 0x352   : > { %2436 = vmatpush.msrb.mxu0 %v3337_v21 }
 0x353   : > { %v1282_v3 = vmax.f32 %v966_v61, %v1243_v0 }
 0x354   : > { %v4330_v49 = vld [vmem:[#allocation2 + $0x60] sm:$0xff] }
 0x355   : > { %v4332_v30 = vld [vmem:[#allocation2 + $0x59] sm:$0xff]  ;;  %1305 = vst.msk [vmem:[#allocation2 + $0x68] sm:$0xff] %vm1291_vm3, %v1282_v3  ;;  %3248 = vmatmul.msk.f32.gmra.mxu1 %vm1291_vm3, %v4330_v49  ;;  %3329 = vmatmul.msk.f32.gmra.mxu2 %vm1291_vm3, %v4315_v50 }
 0x356   : > { %v4334_v55 = vld [vmem:[#allocation2 + $0x5a] sm:$0xff]  ;;  %3264 = vmatmul.msk.f32.gmra.mxu3 %vm1291_vm3, %v4332_v30 }
 0x357   : > { %3281 = vmatmul.msk.f32.gmra.mxu0 %vm1291_vm3, %v4334_v55 }
 0x358   : > { %v1245_v15 = vpop.f32.mrf.mxu2 }
 0x359   : > { %v1246_v53 = vadd.f32 %v1245_v15, %v4254_v62  ;;  %v891_v62 = vpop.f32.mrf.mxu1 }
 0x35a   : > { %v975_v61 = vadd.f32 %v4061_v32, %v891_v62 }
 0x35b   : > { %v1283_v48 = vmax.f32 %v969_v1, %v1246_v53 }
 0x35c   : > { %v4347_v58 = vld [vmem:[#allocation2 + $0x68] sm:$0xff] }
 0x35d   : > { %v4349_v5 = vld [vmem:[#allocation2 + $0x61] sm:$0xff]  ;;  %1306 = vst.msk [vmem:[#allocation2 + $0x70] sm:$0xff] %vm1291_vm3, %v1283_v48  ;;  %3249 = vmatmul.msk.f32.gmra.mxu1 %vm1291_vm3, %v4347_v58  ;;  %3330 = vmatmul.msk.f32.gmra.mxu2 %vm1291_vm3, %v4334_v55  ;;  %v1180_v48 = vpop.f32.mrf.mxu3 }
 0x35e   : > { %v4351_v2 = vld [vmem:[#allocation2 + $0x62] sm:$0xff]  ;;  %3265 = vmatmul.msk.f32.gmra.mxu3 %vm1291_vm3, %v4349_v5 }
 0x35f   : > { %3282 = vmatmul.msk.f32.gmra.mxu0 %vm1291_vm3, %v4351_v2 }
 0x360   : > { %v1248_v57 = vpop.f32.mrf.mxu2 }
 0x361   : > { %v1249_v14 = vadd.f32 %v1248_v57, %v4273_v19  ;;  %v3354_v19 = vld [vmem:[%s4750_s4 + $0x38] sm:$0xff]  ;;  %v894_v3 = vpop.f32.mrf.mxu1 }
 0x362   : > { %2615 = vmatpush.msrb.mxu1 %v3354_v19 }
 0x363   : > { %v1284_v8 = vmax.f32 %v972_v46, %v1249_v14 }
 0x364   : > { %v4367_v37 = vld [vmem:[#allocation2 + $0x70] sm:$0xff] }
 0x365   : > { %v4369_v39 = vld [vmem:[#allocation2 + $0x69] sm:$0xff]  ;;  %1307 = vst.msk [vmem:[#allocation2 + $0x78] sm:$0xff] %vm1291_vm3, %v1284_v8  ;;  %3250 = vmatmul.msk.f32.gmra.mxu1 %vm1291_vm3, %v4367_v37  ;;  %3331 = vmatmul.msk.f32.gmra.mxu2 %vm1291_vm3, %v4351_v2  ;;  %v981_v8 = vadd.f32 %v4079_v43, %v3870_v31  ;;  %v984_v31 = vadd.f32 %v4090_v59, %v3882_v36 }
 0x366   : > { %v4371_v42 = vld [vmem:[#allocation2 + $0x6a] sm:$0xff]  ;;  %3266 = vmatmul.msk.f32.gmra.mxu3 %vm1291_vm3, %v4369_v39  ;;  %v987_v59 = vadd.f32 %v4101_v51, %v3894_v40 }
 0x367   : > { %3283 = vmatmul.msk.f32.gmra.mxu0 %vm1291_vm3, %v4371_v42 }
 0x368   : > { %v1251_v34 = vpop.f32.mrf.mxu2 }
 0x369   : > { %v1252_v0 = vadd.f32 %v1251_v34, %v4303_v63  ;;  %v978_v63 = vadd.f32 %v4070_v38, %v894_v3  ;;  %v1183_v38 = vpop.f32.mrf.mxu3 }
 0x36b   : > { %v1285_v18 = vmax.f32 %v975_v61, %v1252_v0 }
 0x36c   : > { %v4390_v15 = vld [vmem:[#allocation2 + $0x78] sm:$0xff] }
 0x36d   : > { %v4392_v1 = vld [vmem:[#allocation2 + $0x71] sm:$0xff]  ;;  %1308 = vst.msk [vmem:[#allocation2 + $0x80] sm:$0xff] %vm1291_vm3, %v1285_v18  ;;  %3251 = vmatmul.msk.f32.gmra.mxu1 %vm1291_vm3, %v4390_v15  ;;  %3332 = vmatmul.msk.f32.gmra.mxu2 %vm1291_vm3, %v4371_v42 }
 0x36e   : > { %v4394_v53 = vld [vmem:[#allocation2 + $0x72] sm:$0xff]  ;;  %3267 = vmatmul.msk.f32.gmra.mxu3 %vm1291_vm3, %v4392_v1 }
 0x36f   : > { %3284 = vmatmul.msk.f32.gmra.mxu0 %vm1291_vm3, %v4394_v53 }
 0x370   : > { %v1254_v32 = vpop.f32.mrf.mxu2 }
 0x371   : > { %v1255_v21 = vadd.f32 %v1254_v32, %v4326_v11 }
 0x372   : > { %v1396_v62 = vpop.f32.mrf.mxu1 }
 0x373   : > { %v1286_v57 = vmax.f32 %v978_v63, %v1255_v21 }
 0x374   : > { %v4407_v46 = vld [vmem:[#allocation2 + $0x79] sm:$0xff] }
 0x375   : > { %v4409_v14 = vld [vmem:[#allocation2 + $0x7a] sm:$0xff]  ;;  %1309 = vst.msk [vmem:[#allocation2 + $0x88] sm:$0xff] %vm1291_vm3, %v1286_v57  ;;  %3287 = vmatmul.msk.f32.vlgmr.msra.gmra.mxu1 %vm1291_vm3, %v4157_v56  ;;  %3333 = vmatmul.msk.f32.gmra.mxu2 %vm1291_vm3, %v4394_v53 }
 0x376   : > { %3268 = vmatmul.msk.f32.gmra.mxu3 %vm1291_vm3, %v4407_v46 }
 0x377   : > { %3285 = vmatmul.msk.f32.gmra.mxu0 %vm1291_vm3, %v4409_v14 }
 0x378   : > { %v1257_v11 = vpop.f32.mrf.mxu2 }
 0x379   : > { %v1258_v26 = vadd.f32 %v1257_v11, %v1174_v6 }
 0x37a   : > { %v1399_v19 = vpop.f32.mrf.mxu1 }
 0x37b   : > { %v1287_v34 = vmax.f32 %v981_v8, %v1258_v26 }
 0x37c   : > { %v1722_v61 = vpop.f32.mrf.mxu0 }
 0x37d   : > { %1310 = vst.msk [vmem:[#allocation2 + $0x90] sm:$0xff] %vm1291_vm3, %v1287_v34  ;;  %3288 = vmatmul.msk.f32.gmra.mxu1 %vm1291_vm3, %v4172_v23  ;;  %3334 = vmatmul.msk.f32.gmra.mxu2 %vm1291_vm3, %v4409_v14  ;;  %v4433_v23 = vld [vmem:[#allocation2 + $0x82] sm:$0xff] }
 0x37e   : > { %3304 = vmatmul.msk.f32.vlgmr.msra.gmra.mxu3 %vm1291_vm3, %v4174_v24 }
 0x37f   : > { %3338 = vmatmul.msk.f32.vlgmr.msrb.gmra.mxu0 %vm1291_vm3, %v4187_v45 }
 0x380   : > { %v1260_v56 = vpop.f32.mrf.mxu2 }
 0x381   : > { %v1261_v43 = vadd.f32 %v1260_v56, %v1177_v12  ;;  %v1543_v6 = vpop.f32.mrf.mxu3 }
 0x382   : > { %v1607_v0 = vadd.f32 %v1543_v6, %v1396_v62  ;;  %v1402_v3 = vpop.f32.mrf.mxu1 }
 0x383   : > { %v1288_v18 = vmax.f32 %v984_v31, %v1261_v43 }
 0x384   : > { %v1725_v32 = vpop.f32.mrf.mxu0  ;;  %v4435_v63 = vadd.f32 %v1722_v61, %v1607_v0 }
 0x385   : > { %1311 = vst.msk [vmem:[#allocation2 + $0x98] sm:$0xff] %vm1291_vm3, %v1288_v18  ;;  %3289 = vmatmul.msk.f32.gmra.mxu1 %vm1291_vm3, %v4187_v45  ;;  %3335 = vmatmul.msk.f32.gmra.mxu2 %vm1291_vm3, %v4433_v23  ;;  %v4448_v45 = vld [vmem:[#allocation2 + $0x8a] sm:$0xff] }
 0x386   : > { %3305 = vmatmul.msk.f32.gmra.mxu3 %vm1291_vm3, %v4189_v16 }
 0x387   : > { %3339 = vmatmul.msk.f32.gmra.mxu0 %vm1291_vm3, %v4200_v27 }
 0x388   : > { %v1263_v36 = vpop.f32.mrf.mxu2 }
 0x389   : > { %v1264_v24 = vadd.f32 %v1263_v36, %v1180_v48  ;;  %v1546_v12 = vpop.f32.mrf.mxu3 }
 0x38a   : > { %v1608_v21 = vadd.f32 %v1546_v12, %v1399_v19  ;;  %v1405_v62 = vpop.f32.mrf.mxu1 }
 0x38b   : > { %v1289_v57 = vmax.f32 %v987_v59, %v1264_v24 }
 0x38c   : > { %v1728_v38 = vpop.f32.mrf.mxu0  ;;  %v4450_v11 = vadd.f32 %v1725_v32, %v1608_v21 }
 0x38d   : > { %1312 = vst.msk [vmem:[#allocation2 + $0xa0] sm:$0xff] %vm1291_vm3, %v1289_v57  ;;  %3290 = vmatmul.msk.f32.gmra.mxu1 %vm1291_vm3, %v4200_v27  ;;  %3336 = vmatmul.msk.f32.gmra.mxu2 %vm1291_vm3, %v4448_v45 }
 0x38e   : > { %3306 = vmatmul.msk.f32.gmra.mxu3 %vm1291_vm3, %v4202_v29 }
 0x38f   : > { %3340 = vmatmul.msk.f32.gmra.mxu0 %vm1291_vm3, %v4218_v44 }
 0x390   : > { %v1266_v40 = vpop.f32.mrf.mxu2 }
 0x391   : > { %v1549_v51 = vpop.f32.mrf.mxu3 }
 0x392   : > { %v1609_v16 = vadd.f32 %v1549_v51, %v1402_v3  ;;  %v1408_v48 = vpop.f32.mrf.mxu1 }
 0x394   : > { %v1731_v8 = vpop.f32.mrf.mxu0  ;;  %v4461_v26 = vadd.f32 %v1728_v38, %v1609_v16 }
 0x395   : > { %3291 = vmatmul.msk.f32.gmra.mxu1 %vm1291_vm3, %v4218_v44 }
 0x396   : > { %3307 = vmatmul.msk.f32.gmra.mxu3 %vm1291_vm3, %v4220_v47 }
 0x397   : > { %3341 = vmatmul.msk.f32.gmra.mxu0 %vm1291_vm3, %v4237_v52 }
 0x399   : > { %v1552_v27 = vpop.f32.mrf.mxu3 }
 0x39a   : > { %v1610_v19 = vadd.f32 %v1552_v27, %v1405_v62  ;;  %v1411_v34 = vpop.f32.mrf.mxu1 }
 0x39c   : > { %v1734_v61 = vpop.f32.mrf.mxu0  ;;  %v4469_v56 = vadd.f32 %v1731_v8, %v1610_v19 }
 0x39d   : > { %3292 = vmatmul.msk.f32.gmra.mxu1 %vm1291_vm3, %v4237_v52 }
 0x39e   : > { %3308 = vmatmul.msk.f32.gmra.mxu3 %vm1291_vm3, %v4239_v41 }
 0x39f   : > { %3342 = vmatmul.msk.f32.gmra.mxu0 %vm1291_vm3, %v4256_v28 }
 0x3a1   : > { %v1555_v44 = vpop.f32.mrf.mxu3 }
 0x3a2   : > { %v1611_v31 = vadd.f32 %v1555_v44, %v1408_v48  ;;  %v1414_v43 = vpop.f32.mrf.mxu1 }
 0x3a4   : > { %v1737_v6 = vpop.f32.mrf.mxu0  ;;  %v4477_v0 = vadd.f32 %v1734_v61, %v1611_v31 }
 0x3a5   : > { %3293 = vmatmul.msk.f32.gmra.mxu1 %vm1291_vm3, %v4256_v28 }
 0x3a6   : > { %3309 = vmatmul.msk.f32.gmra.mxu3 %vm1291_vm3, %v4258_v4 }
 0x3a7   : > { %3343 = vmatmul.msk.f32.gmra.mxu0 %vm1291_vm3, %v4275_v9 }
 0x3a9   : > { %v1558_v52 = vpop.f32.mrf.mxu3 }
 0x3aa   : > { %v1612_v3 = vadd.f32 %v1558_v52, %v1411_v34  ;;  %v1417_v18 = vpop.f32.mrf.mxu1 }
 0x3ac   : > { %v1740_v32 = vpop.f32.mrf.mxu0  ;;  %v4485_v36 = vadd.f32 %v1737_v6, %v1612_v3 }
 0x3ad   : > { %3294 = vmatmul.msk.f32.gmra.mxu1 %vm1291_vm3, %v4275_v9 }
 0x3ae   : > { %3310 = vmatmul.msk.f32.gmra.mxu3 %vm1291_vm3, %v4277_v10 }
 0x3af   : > { %3344 = vmatmul.msk.f32.gmra.mxu0 %vm1291_vm3, %v4292_v22 }
 0x3b1   : > { %v1561_v28 = vpop.f32.mrf.mxu3 }
 0x3b2   : > { %v1613_v59 = vadd.f32 %v1561_v28, %v1414_v43  ;;  %v1420_v24 = vpop.f32.mrf.mxu1  ;;  %v2367_v28 = vld [vmem:[#allocation2 + $0x80] sm:$0xff] }
 0x3b4   : > { %v1743_v12 = vpop.f32.mrf.mxu0  ;;  %v4493_v21 = vadd.f32 %v1740_v32, %v1613_v59 }
 0x3b5   : > { %3295 = vmatmul.msk.f32.gmra.mxu1 %vm1291_vm3, %v4292_v22 }
 0x3b6   : > { %3311 = vmatmul.msk.f32.gmra.mxu3 %vm1291_vm3, %v4294_v25 }
 0x3b7   : > { %3345 = vmatmul.msk.f32.gmra.mxu0 %vm1291_vm3, %v4311_v7 }
 0x3b9   : > { %v1564_v9 = vpop.f32.mrf.mxu3 }
 0x3ba   : > { %v1614_v62 = vadd.f32 %v1564_v9, %v1417_v18  ;;  %v1423_v57 = vpop.f32.mrf.mxu1  ;;  %v2368_v9 = vld [vmem:[#allocation2 + $0x88] sm:$0xff] }
 0x3bc   : > { %v1746_v38 = vpop.f32.mrf.mxu0  ;;  %v4501_v40 = vadd.f32 %v1743_v12, %v1614_v62 }
 0x3bd   : > { %3296 = vmatmul.msk.f32.gmra.mxu1 %vm1291_vm3, %v4311_v7 }
 0x3be   : > { %3312 = vmatmul.msk.f32.gmra.mxu3 %vm1291_vm3, %v4313_v60 }
 0x3bf   : > { %3346 = vmatmul.msk.f32.gmra.mxu0 %vm1291_vm3, %v4330_v49 }
 0x3c1   : > { %v1567_v22 = vpop.f32.mrf.mxu3 }
 0x3c2   : > { %v1615_v51 = vadd.f32 %v1567_v22, %v1420_v24  ;;  %v1426_v16 = vpop.f32.mrf.mxu1 }
 0x3c4   : > { %v1749_v48 = vpop.f32.mrf.mxu0  ;;  %v4509_v8 = vadd.f32 %v1746_v38, %v1615_v51  ;;  %v4549_v51 = vld [vmem:[#allocation2 + $0x81] sm:$0xff] }
 0x3c5   : > { %3297 = vmatmul.msk.f32.gmra.mxu1 %vm1291_vm3, %v4330_v49 }
 0x3c6   : > { %3313 = vmatmul.msk.f32.gmra.mxu3 %vm1291_vm3, %v4332_v30 }
 0x3c7   : > { %3347 = vmatmul.msk.f32.gmra.mxu0 %vm1291_vm3, %v4347_v58 }
 0x3c9   : > { %v1570_v7 = vpop.f32.mrf.mxu3 }
 0x3ca   : > { %v1616_v27 = vadd.f32 %v1570_v7, %v1423_v57  ;;  %v1429_v19 = vpop.f32.mrf.mxu1 }
 0x3cc   : > { %v1752_v34 = vpop.f32.mrf.mxu0  ;;  %v4517_v61 = vadd.f32 %v1749_v48, %v1616_v27 }
 0x3cd   : > { %3298 = vmatmul.msk.f32.gmra.mxu1 %vm1291_vm3, %v4347_v58 }
 0x3ce   : > { %3314 = vmatmul.msk.f32.gmra.mxu3 %vm1291_vm3, %v4349_v5 }
 0x3cf   : > { %3348 = vmatmul.msk.f32.gmra.mxu0 %vm1291_vm3, %v4367_v37 }
 0x3d1   : > { %v1573_v49 = vpop.f32.mrf.mxu3 }
 0x3d2   : > { %v1617_v44 = vadd.f32 %v1573_v49, %v1426_v16  ;;  %v1432_v31 = vpop.f32.mrf.mxu1  ;;  %v2369_v16 = vld [vmem:[#allocation2 + $0x90] sm:$0xff] }
 0x3d3   : > { %v4556_v49 = vld [vmem:[#allocation2 + $0x89] sm:$0xff] }
 0x3d4   : > { %v1755_v43 = vpop.f32.mrf.mxu0  ;;  %v4525_v6 = vadd.f32 %v1752_v34, %v1617_v44  ;;  %v2370_v44 = vld [vmem:[#allocation2 + $0x98] sm:$0xff] }
 0x3d5   : > { %3299 = vmatmul.msk.f32.gmra.mxu1 %vm1291_vm3, %v4367_v37 }
 0x3d6   : > { %3315 = vmatmul.msk.f32.gmra.mxu3 %vm1291_vm3, %v4369_v39 }
 0x3d7   : > { %3349 = vmatmul.msk.f32.gmra.mxu0 %vm1291_vm3, %v4390_v15 }
 0x3d9   : > { %v1576_v58 = vpop.f32.mrf.mxu3 }
 0x3da   : > { %v1618_v52 = vadd.f32 %v1576_v58, %v1429_v19  ;;  %v1435_v3 = vpop.f32.mrf.mxu1 }
 0x3dc   : > { %v4533_v18 = vadd.f32 %v1755_v43, %v1618_v52  ;;  %v1758_v32 = vpop.f32.mrf.mxu0 }
 0x3dd   : > { %3300 = vmatmul.msk.f32.gmra.mxu1 %vm1291_vm3, %v4390_v15 }
 0x3de   : > { %3316 = vmatmul.msk.f32.gmra.mxu3 %vm1291_vm3, %v4392_v1 }
 0x3df   : > { %3350 = vmatmul.msk.f32.gmra.mxu0 %vm1291_vm3, %v2367_v28 }
 0x3e1   : > { %v1579_v37 = vpop.f32.mrf.mxu3 }
 0x3e2   : > { %v1619_v59 = vadd.f32 %v1579_v37, %v1432_v31  ;;  %v1438_v24 = vpop.f32.mrf.mxu1 }
 0x3e4   : > { %v4540_v12 = vadd.f32 %v1758_v32, %v1619_v59  ;;  %v1761_v15 = vpop.f32.mrf.mxu0 }
 0x3e5   : > { %3301 = vmatmul.msk.f32.gmra.mxu1 %vm1291_vm3, %v2367_v28 }
 0x3e6   : > { %3317 = vmatmul.msk.f32.gmra.mxu3 %vm1291_vm3, %v4407_v46 }
 0x3e7   : > { %3351 = vmatmul.msk.f32.gmra.mxu0 %vm1291_vm3, %v2368_v9 }
 0x3e9   : > { %v1582_v62 = vpop.f32.mrf.mxu3 }
 0x3ea   : > { %v1620_v57 = vadd.f32 %v1582_v62, %v1435_v3  ;;  %v1441_v38 = vpop.f32.mrf.mxu1 }
 0x3ec   : > { %v4546_v22 = vadd.f32 %v1761_v15, %v1620_v57  ;;  %v1764_v48 = vpop.f32.mrf.mxu0 }
 0x3ed   : > { %3302 = vmatmul.msk.f32.gmra.mxu1 %vm1291_vm3, %v2368_v9 }
 0x3ee   : > { %3318 = vmatmul.msk.f32.gmra.mxu3 %vm1291_vm3, %v4549_v51 }
 0x3ef   : > { %3352 = vmatmul.msk.f32.gmra.mxu0 %vm1291_vm3, %v2369_v16 }
 0x3f1   : > { %v1585_v7 = vpop.f32.mrf.mxu3 }
 0x3f2   : > { %v1621_v27 = vadd.f32 %v1585_v7, %v1438_v24  ;;  %v1901_v19 = vpop.f32.mrf.mxu1 }
 0x3f3   : > { %v1965_v32 = vadd.f32 %v1901_v19, %v4435_v63 }
 0x3f4   : > { %v4554_v34 = vadd.f32 %v1764_v48, %v1621_v27  ;;  %v1767_v52 = vpop.f32.mrf.mxu0 }
 0x3f5   : > { %3355 = vmatmul.msk.f32.vlgmr.msrb.gmra.mxu1 %vm1291_vm3, %v4202_v29 }
 0x3f6   : > { %3319 = vmatmul.msk.f32.gmra.mxu3 %vm1291_vm3, %v4556_v49 }
 0x3f7   : > { %3353 = vmatmul.msk.f32.gmra.mxu0 %vm1291_vm3, %v2370_v44 }
 0x3f9   : > { %v1588_v31 = vpop.f32.mrf.mxu3 }
 0x3fa   : > { %v1622_v43 = vadd.f32 %v1588_v31, %v1441_v38  ;;  %v1904_v58 = vpop.f32.mrf.mxu1 }
 0x3fb   : > { %v1966_v59 = vadd.f32 %v1904_v58, %v4450_v11  ;;  %v2548_v58 = vld [vmem:[#allocation2 + $0x91] sm:$0xff] }
 0x3fc   : > { %v4563_v3 = vadd.f32 %v1767_v52, %v1622_v43 }
 0x3fd   : > { %3356 = vmatmul.msk.f32.gmra.mxu1 %vm1291_vm3, %v4220_v47 }
 0x3fe   : > { %3372 = vmatmul.msk.f32.vlgmr.msrb.gmra.mxu3 %vm1291_vm3, %v4204_v33 }
 0x401   : > { %v2080_v29 = vpop.f32.mrf.mxu3 }
 0x402   : > { %v4570_v28 = vadd.f32 %v2080_v29, %v1965_v32  ;;  %v1907_v37 = vpop.f32.mrf.mxu1 }
 0x403   : > { %v1967_v33 = vadd.f32 %v1907_v37, %v4461_v26  ;;  %v2549_v37 = vld [vmem:[#allocation2 + $0x99] sm:$0xff] }
 0x405   : > { %3357 = vmatmul.msk.f32.gmra.mxu1 %vm1291_vm3, %v4239_v41 }
 0x406   : > { %3373 = vmatmul.msk.f32.gmra.mxu3 %vm1291_vm3, %v4222_v54 }
 0x409   : > { %v2083_v24 = vpop.f32.mrf.mxu3 }
 0x40a   : > { %v4577_v9 = vadd.f32 %v2083_v24, %v1966_v59  ;;  %v1910_v47 = vpop.f32.mrf.mxu1  ;;  %v2727_v59 = vld [vmem:[#allocation2 + $0x92] sm:$0xff] }
 0x40b   : > { %v1968_v54 = vadd.f32 %v1910_v47, %v4469_v56 }
 0x40d   : > { %3358 = vmatmul.msk.f32.gmra.mxu1 %vm1291_vm3, %v4258_v4 }
 0x40e   : > { %3374 = vmatmul.msk.f32.gmra.mxu3 %vm1291_vm3, %v4241_v35 }
 0x411   : > { %v2086_v63 = vpop.f32.mrf.mxu3 }
 0x412   : > { %v4584_v15 = vadd.f32 %v2086_v63, %v1967_v33  ;;  %v1913_v41 = vpop.f32.mrf.mxu1 }
 0x413   : > { %v1969_v35 = vadd.f32 %v1913_v41, %v4477_v0 }
 0x415   : > { %3359 = vmatmul.msk.f32.gmra.mxu1 %vm1291_vm3, %v4277_v10 }
 0x416   : > { %3375 = vmatmul.msk.f32.gmra.mxu3 %vm1291_vm3, %v4260_v13 }
 0x419   : > { %v2089_v11 = vpop.f32.mrf.mxu3 }
 0x41a   : > { %v4591_v62 = vadd.f32 %v2089_v11, %v1968_v54  ;;  %v1916_v4 = vpop.f32.mrf.mxu1 }
 0x41b   : > { %v1970_v13 = vadd.f32 %v1916_v4, %v4485_v36 }
 0x41d   : > { %3360 = vmatmul.msk.f32.gmra.mxu1 %vm1291_vm3, %v4294_v25 }
 0x41e   : > { %3376 = vmatmul.msk.f32.gmra.mxu3 %vm1291_vm3, %v4279_v20 }
 0x421   : > { %v2092_v26 = vpop.f32.mrf.mxu3 }
 0x422   : > { %v4598_v57 = vadd.f32 %v2092_v26, %v1969_v35  ;;  %v1919_v10 = vpop.f32.mrf.mxu1 }
 0x423   : > { %v1971_v20 = vadd.f32 %v1919_v10, %v4493_v21 }
 0x425   : > { %3361 = vmatmul.msk.f32.gmra.mxu1 %vm1291_vm3, %v4313_v60 }
 0x426   : > { %3377 = vmatmul.msk.f32.gmra.mxu3 %vm1291_vm3, %v4296_v17 }
 0x429   : > { %v2095_v56 = vpop.f32.mrf.mxu3 }
 0x42a   : > { %v4605_v38 = vadd.f32 %v2095_v56, %v1970_v13  ;;  %v1922_v25 = vpop.f32.mrf.mxu1 }
 0x42b   : > { %v1972_v36 = vadd.f32 %v1922_v25, %v4501_v40 }
 0x42d   : > { %3362 = vmatmul.msk.f32.gmra.mxu1 %vm1291_vm3, %v4332_v30 }
 0x42e   : > { %3378 = vmatmul.msk.f32.gmra.mxu3 %vm1291_vm3, %v4315_v50 }
 0x431   : > { %v2098_v0 = vpop.f32.mrf.mxu3 }
 0x432   : > { %v4612_v16 = vadd.f32 %v2098_v0, %v1971_v20  ;;  %v1925_v60 = vpop.f32.mrf.mxu1 }
 0x433   : > { %v1973_v17 = vadd.f32 %v1925_v60, %v4509_v8  ;;  %v4676_v60 = vld [vmem:[%s4751_s5] ss:$0 sm:$0xff] }
 0x435   : > { %3363 = vmatmul.msk.f32.gmra.mxu1 %vm1291_vm3, %v4349_v5 }
 0x436   : > { %3379 = vmatmul.msk.f32.gmra.mxu3 %vm1291_vm3, %v4334_v55 }
 0x439   : > { %v2101_v30 = vpop.f32.mrf.mxu3 }
 0x43a   : > { %v4620_v48 = vadd.f32 %v2101_v30, %v1972_v36  ;;  %v1928_v50 = vpop.f32.mrf.mxu1 }
 0x43b   : > { %v1974_v21 = vadd.f32 %v1928_v50, %v4517_v61  ;;  %v4682_v50 = vld [vmem:[%s4752_s6] ss:$0 sm:$0xff] }
 0x43d   : > { %3364 = vmatmul.msk.f32.gmra.mxu1 %vm1291_vm3, %v4369_v39 }
 0x43e   : > { %3380 = vmatmul.msk.f32.gmra.mxu3 %vm1291_vm3, %v4351_v2 }
 0x441   : > { %v2104_v8 = vpop.f32.mrf.mxu3 }
 0x442   : > { %v4627_v7 = vadd.f32 %v2104_v8, %v1973_v17  ;;  %v1931_v5 = vpop.f32.mrf.mxu1 }
 0x443   : > { %v1975_v55 = vadd.f32 %v1931_v5, %v4525_v6 }
 0x445   : > { %3365 = vmatmul.msk.f32.gmra.mxu1 %vm1291_vm3, %v4392_v1 }
 0x446   : > { %3381 = vmatmul.msk.f32.gmra.mxu3 %vm1291_vm3, %v4371_v42 }
 0x449   : > { %v2107_v40 = vpop.f32.mrf.mxu3 }
 0x44a   : > { %v4634_v61 = vadd.f32 %v2107_v40, %v1974_v21  ;;  %v1934_v27 = vpop.f32.mrf.mxu1 }
 0x44b   : > { %v1976_v39 = vadd.f32 %v1934_v27, %v4533_v18 }
 0x44d   : > { %3366 = vmatmul.msk.f32.gmra.mxu1 %vm1291_vm3, %v4407_v46  ;;  %v2259_v46 = vpop.f32.mrf.mxu2 }
 0x44e   : > { %3382 = vmatmul.msk.f32.gmra.mxu3 %vm1291_vm3, %v4394_v53  ;;  %v2438_v53 = vpop.f32.mrf.mxu0  ;;  %v2323_v4 = vadd.f32 %v2259_v46, %v4570_v28 }
 0x450   : > { %v2502_v26 = vadd.f32 %v2438_v53, %v2323_v4 }
 0x451   : > { %v2110_v2 = vpop.f32.mrf.mxu3 }
 0x452   : > { %v4641_v6 = vadd.f32 %v2110_v2, %v1975_v55  ;;  %v1937_v19 = vpop.f32.mrf.mxu1 }
 0x453   : > { %v1977_v1 = vadd.f32 %v1937_v19, %v4540_v12 }
 0x455   : > { %3367 = vmatmul.msk.f32.gmra.mxu1 %vm1291_vm3, %v4549_v51  ;;  %v2262_v52 = vpop.f32.mrf.mxu2 }
 0x456   : > { %3383 = vmatmul.msk.f32.gmra.mxu3 %vm1291_vm3, %v4409_v14  ;;  %v2324_v13 = vadd.f32 %v2262_v52, %v4577_v9 }
 0x459   : > { %v2113_v42 = vpop.f32.mrf.mxu3 }
 0x45a   : > { %v4648_v18 = vadd.f32 %v2113_v42, %v1976_v39  ;;  %v1940_v44 = vpop.f32.mrf.mxu1 }
 0x45b   : > { %v1978_v31 = vadd.f32 %v1940_v44, %v4546_v22  ;;  %v2441_v22 = vpop.f32.mrf.mxu0 }
 0x45c   : > { %v2503_v36 = vadd.f32 %v2441_v22, %v2324_v13 }
 0x45d   : > { %3368 = vmatmul.msk.f32.gmra.mxu1 %vm1291_vm3, %v4556_v49 }
 0x45e   : > { %3384 = vmatmul.msk.f32.gmra.mxu3 %vm1291_vm3, %v4433_v23 }
 0x461   : > { %v2116_v12 = vpop.f32.mrf.mxu3 }
 0x462   : > { %v4655_v43 = vadd.f32 %v2116_v12, %v1977_v1  ;;  %v1943_v51 = vpop.f32.mrf.mxu1 }
 0x463   : > { %v1979_v14 = vadd.f32 %v1943_v51, %v4554_v34  ;;  %v2265_v34 = vpop.f32.mrf.mxu2  ;;  %v2444_v47 = vpop.f32.mrf.mxu0 }
 0x464   : > { %v2325_v5 = vadd.f32 %v2265_v34, %v4584_v15 }
 0x465   : > { %3369 = vmatmul.msk.f32.gmra.mxu1 %vm1291_vm3, %v2548_v58 }
 0x466   : > { %3385 = vmatmul.msk.f32.gmra.mxu3 %vm1291_vm3, %v4448_v45  ;;  %v2728_v45 = vld [vmem:[#allocation2 + $0x9a] sm:$0xff]  ;;  %v2504_v1 = vadd.f32 %v2444_v47, %v2325_v5 }
 0x469   : > { %v2119_v32 = vpop.f32.mrf.mxu3 }
 0x46a   : > { %v4661_v49 = vadd.f32 %v2119_v32, %v1978_v31  ;;  %v1946_v29 = vpop.f32.mrf.mxu1 }
 0x46b   : > { %v1980_v23 = vadd.f32 %v1946_v29, %v4563_v3  ;;  %v2268_v41 = vpop.f32.mrf.mxu2  ;;  %v2447_v35 = vpop.f32.mrf.mxu0 }
 0x46c   : > { %v2326_v15 = vadd.f32 %v2268_v41, %v4591_v62 }
 0x46d   : > { %3370 = vmatmul.msk.f32.gmra.mxu1 %vm1291_vm3, %v2549_v37 }
 0x46e   : > { %3386 = vmatmul.msk.f32.gmra.mxu3 %vm1291_vm3, %v2727_v59  ;;  %v2505_v51 = vadd.f32 %v2447_v35, %v2326_v15 }
 0x471   : > { %v2122_v24 = vpop.f32.mrf.mxu3 }
 0x472   : > { %v4666_v33 = vadd.f32 %v2122_v24, %v1979_v14  ;;  %v2617_v63 = vpop.f32.mrf.mxu1 }
 0x473   : > { %v2681_v56 = vadd.f32 %v2617_v63, %v2502_v26  ;;  %v2271_v20 = vpop.f32.mrf.mxu2  ;;  %v2450_v17 = vpop.f32.mrf.mxu0 }
 0x474   : > { %v2327_v37 = vadd.f32 %v2271_v20, %v4598_v57 }
 0x476   : > { %3387 = vmatmul.msk.f32.gmra.mxu3 %vm1291_vm3, %v2728_v45  ;;  %v2506_v47 = vadd.f32 %v2450_v17, %v2327_v37 }
 0x479   : > { %v2125_v54 = vpop.f32.mrf.mxu3 }
 0x47a   : > { %v4669_v11 = vadd.f32 %v2125_v54, %v1980_v23  ;;  %v2620_v3 = vpop.f32.mrf.mxu1 }
 0x47b   : > { %v2682_v30 = vadd.f32 %v2620_v3, %v2503_v36  ;;  %v2274_v27 = vpop.f32.mrf.mxu2  ;;  %v2453_v2 = vpop.f32.mrf.mxu0 }
 0x47c   : > { %v2328_v54 = vadd.f32 %v2274_v27, %v4605_v38 }
 0x47e   : > { %v2507_v57 = vadd.f32 %v2453_v2, %v2328_v54 }
 0x481   : > { %v2796_v10 = vpop.f32.mrf.mxu3 }
 0x482   : > { %v2623_v25 = vpop.f32.mrf.mxu1  ;;  %v2860_v0 = vadd.f32 %v2796_v10, %v2681_v56 }
 0x483   : > { %v2683_v46 = vadd.f32 %v2623_v25, %v2504_v1  ;;  %v2277_v14 = vpop.f32.mrf.mxu2  ;;  %v2456_v32 = vpop.f32.mrf.mxu0 }
 0x484   : > { %v2912_v28 = vmul.f32 %v4676_v60, %v2860_v0  ;;  %v2329_v36 = vadd.f32 %v2277_v14, %v4612_v16 }
 0x486   : > { %v2932_v55 = vadd.f32 %v4682_v50, %v2912_v28 }
 0x488   : > { %v2948_v19 = vmax.f32 %v2932_v55, 0.0 }
 0x489   : > { %v2799_v9 = vpop.f32.mrf.mxu3 }
 0x48a   : > { %v2861_v21 = vadd.f32 %v2799_v9, %v2682_v30  ;;  %v2626_v8 = vpop.f32.mrf.mxu1 }
 0x48b   : > { %v2684_v58 = vadd.f32 %v2626_v8, %v2505_v51  ;;  %v2280_v45 = vpop.f32.mrf.mxu2  ;;  %v2459_v26 = vpop.f32.mrf.mxu0  ;;  %v2508_v8 = vadd.f32 %v2456_v32, %v2329_v36 }
 0x48c   : > { %v2913_v40 = vmul.f32 %v4676_v60, %v2861_v21 }
 0x48e   : > { %v2933_v39 = vadd.f32 %v4682_v50, %v2913_v40  ;;  %v2330_v40 = vadd.f32 %v2280_v45, %v4620_v48 }
 0x490   : > { %v2949_v42 = vmax.f32 %v2933_v39, 0.0  ;;  %v2509_v16 = vadd.f32 %v2459_v26, %v2330_v40 }
 0x491   : > { %v2802_v44 = vpop.f32.mrf.mxu3 }
 0x492   : > { %v3413_v31 = vpack.c.bf16 %v2949_v42, %v2948_v19  ;;  %v2629_v53 = vpop.f32.mrf.mxu1  ;;  %v2862_v12 = vadd.f32 %v2802_v44, %v2683_v46 }
 0x493   : > { %v2685_v3 = vadd.f32 %v2629_v53, %v2506_v47  ;;  %v2283_v17 = vpop.f32.mrf.mxu2  ;;  %v2462_v28 = vpop.f32.mrf.mxu0 }
 0x494   : > { %3414 = vst [vmem:[%s4692_s22] sm:$0xff] %v3413_v31   ;;  %v2914_v52 = vmul.f32 %v4676_v60, %v2862_v12  ;;  %v2331_v12 = vadd.f32 %v2283_v17, %v4627_v7 }
 0x496   : > { %v2934_v59 = vadd.f32 %v4682_v50, %v2914_v52 }
 0x498   : > { %v2950_v24 = vmax.f32 %v2934_v59, 0.0 }
 0x499   : > { %v2805_v22 = vpop.f32.mrf.mxu3 }
 0x49a   : > { %v2863_v29 = vadd.f32 %v2805_v22, %v2684_v58  ;;  %v2632_v23 = vpop.f32.mrf.mxu1  ;;  %v2510_v22 = vadd.f32 %v2462_v28, %v2331_v12 }
 0x49b   : > { %v2686_v13 = vadd.f32 %v2632_v23, %v2507_v57  ;;  %v2286_v1 = vpop.f32.mrf.mxu2  ;;  %v2465_v42 = vpop.f32.mrf.mxu0 }
 0x49c   : > { %v2915_v62 = vmul.f32 %v4676_v60, %v2863_v29  ;;  %v2332_v23 = vadd.f32 %v2286_v1, %v4634_v61 }
 0x49e   : > { %v2935_v34 = vadd.f32 %v4682_v50, %v2915_v62  ;;  %v2511_v7 = vadd.f32 %v2465_v42, %v2332_v23 }
 0x4a0   : > { %v2951_v63 = vmax.f32 %v2935_v34, 0.0 }
 0x4a1   : > { %v2808_v41 = vpop.f32.mrf.mxu3 }
 0x4a2   : > { %v3418_v4 = vpack.c.bf16 %v2951_v63, %v2950_v24  ;;  %v2635_v35 = vpop.f32.mrf.mxu1  ;;  %v2864_v10 = vadd.f32 %v2808_v41, %v2685_v3 }
 0x4a3   : > { %v2687_v27 = vadd.f32 %v2635_v35, %v2508_v8  ;;  %v2289_v58 = vpop.f32.mrf.mxu2  ;;  %v2468_v37 = vpop.f32.mrf.mxu0 }
 0x4a4   : > { %3450 = vst [vmem:[%s4692_s22 + $0x8] sm:$0xff] %v3418_v4   ;;  %v2916_v56 = vmul.f32 %v4676_v60, %v2864_v10  ;;  %v2333_v3 = vadd.f32 %v2289_v58, %v4641_v6 }
 0x4a6   : > { %v2936_v30 = vadd.f32 %v4682_v50, %v2916_v56 }
 0x4a8   : > { %v2952_v21 = vmax.f32 %v2936_v30, 0.0 }
 0x4a9   : > { %v2811_v25 = vpop.f32.mrf.mxu3 }
 0x4aa   : > { %v2865_v20 = vadd.f32 %v2811_v25, %v2686_v13  ;;  %v2638_v0 = vpop.f32.mrf.mxu1  ;;  %v2512_v13 = vadd.f32 %v2468_v37, %v2333_v3 }
 0x4ab   : > { %v2688_v44 = vadd.f32 %v2638_v0, %v2509_v16  ;;  %v2292_v45 = vpop.f32.mrf.mxu2  ;;  %v2471_v4 = vpop.f32.mrf.mxu0 }
 0x4ac   : > { %v2917_v38 = vmul.f32 %v4676_v60, %v2865_v20  ;;  %v2334_v20 = vadd.f32 %v2292_v45, %v4648_v18 }
 0x4ae   : > { %v2937_v9 = vadd.f32 %v4682_v50, %v2917_v38  ;;  %v2513_v38 = vadd.f32 %v2471_v4, %v2334_v20 }
 0x4b0   : > { %v2953_v5 = vmax.f32 %v2937_v9, 0.0 }
 0x4b1   : > { %v2814_v55 = vpop.f32.mrf.mxu3 }
 0x4b2   : > { %v3423_v39 = vpack.c.bf16 %v2953_v5, %v2952_v21  ;;  %v2641_v2 = vpop.f32.mrf.mxu1  ;;  %v2866_v19 = vadd.f32 %v2814_v55, %v2687_v27 }
 0x4b3   : > { %v2689_v59 = vadd.f32 %v2641_v2, %v2510_v22  ;;  %v2295_v36 = vpop.f32.mrf.mxu2  ;;  %v2474_v6 = vpop.f32.mrf.mxu0 }
 0x4b4   : > { %3451 = vst [vmem:[%s4692_s22 + $0x10] sm:$0xff] %v3423_v39   ;;  %v2918_v15 = vmul.f32 %v4676_v60, %v2866_v19  ;;  %v2335_v55 = vadd.f32 %v2295_v36, %v4655_v43 }
 0x4b6   : > { %v2938_v51 = vadd.f32 %v4682_v50, %v2918_v15  ;;  %v2514_v1 = vadd.f32 %v2474_v6, %v2335_v55 }
 0x4b8   : > { %v2954_v52 = vmax.f32 %v2938_v51, 0.0 }
 0x4b9   : > { %v2817_v46 = vpop.f32.mrf.mxu3 }
 0x4ba   : > { %v2867_v31 = vadd.f32 %v2817_v46, %v2688_v44  ;;  %v2644_v53 = vpop.f32.mrf.mxu1 }
 0x4bb   : > { %v2690_v47 = vadd.f32 %v2644_v53, %v2511_v7  ;;  %v2298_v27 = vpop.f32.mrf.mxu2  ;;  %v2477_v2 = vpop.f32.mrf.mxu0 }
 0x4bc   : > { %v2919_v48 = vmul.f32 %v4676_v60, %v2867_v31  ;;  %v2336_v15 = vadd.f32 %v2298_v27, %v4661_v49 }
 0x4be   : > { %v2939_v14 = vadd.f32 %v4682_v50, %v2919_v48  ;;  %v2515_v43 = vadd.f32 %v2477_v2, %v2336_v15 }
 0x4c0   : > { %v2955_v32 = vmax.f32 %v2939_v14, 0.0 }
 0x4c1   : > { %v2820_v29 = vpop.f32.mrf.mxu3 }
 0x4c2   : > { %v3428_v62 = vpack.c.bf16 %v2955_v32, %v2954_v52  ;;  %v2647_v34 = vpop.f32.mrf.mxu1  ;;  %v2868_v24 = vadd.f32 %v2820_v29, %v2689_v59 }
 0x4c3   : > { %v2691_v0 = vadd.f32 %v2647_v34, %v2512_v13  ;;  %v2301_v12 = vpop.f32.mrf.mxu2  ;;  %v2480_v52 = vpop.f32.mrf.mxu0 }
 0x4c4   : > { %3452 = vst [vmem:[%s4692_s22 + $0x18] sm:$0xff] %v3428_v62   ;;  %v2920_v63 = vmul.f32 %v4676_v60, %v2868_v24  ;;  %v2337_v32 = vadd.f32 %v2301_v12, %v4666_v33 }
 0x4c6   : > { %v2940_v35 = vadd.f32 %v4682_v50, %v2920_v63  ;;  %v2516_v59 = vadd.f32 %v2480_v52, %v2337_v32 }
 0x4c8   : > { %v2956_v57 = vmax.f32 %v2940_v35, 0.0 }
 0x4c9   : > { %v2823_v41 = vpop.f32.mrf.mxu3 }
 0x4ca   : > { %v2869_v54 = vadd.f32 %v2823_v41, %v2690_v47  ;;  %v2650_v26 = vpop.f32.mrf.mxu1 }
 0x4cb   : > { %v2692_v9 = vadd.f32 %v2650_v26, %v2513_v38  ;;  %v2304_v34 = vpop.f32.mrf.mxu2  ;;  %v2483_v41 = vpop.f32.mrf.mxu0 }
 0x4cc   : > { %v2921_v61 = vmul.f32 %v4676_v60, %v2869_v54  ;;  %v2338_v7 = vadd.f32 %v2304_v34, %v4669_v11 }
 0x4ce   : > { %v2941_v10 = vadd.f32 %v4682_v50, %v2921_v61  ;;  %v2517_v54 = vadd.f32 %v2483_v41, %v2338_v7 }
 0x4d0   : > { %v2957_v56 = vmax.f32 %v2941_v10, 0.0 }
 0x4d1   : > { %v2826_v25 = vpop.f32.mrf.mxu3 }
 0x4d2   : > { %v3433_v17 = vpack.c.bf16 %v2957_v56, %v2956_v57  ;;  %v2870_v30 = vadd.f32 %v2826_v25, %v2691_v0  ;;  %v2653_v28 = vpop.f32.mrf.mxu1 }
 0x4d3   : > { %v2693_v46 = vadd.f32 %v2653_v28, %v2514_v1 }
 0x4d4   : > { %3453 = vst [vmem:[%s4692_s22 + $0x20] sm:$0xff] %v3433_v17   ;;  %v2922_v21 = vmul.f32 %v4676_v60, %v2870_v30 }
 0x4d6   : > { %v2942_v40 = vadd.f32 %v4682_v50, %v2922_v21 }
 0x4d8   : > { %v2958_v19 = vmax.f32 %v2942_v40, 0.0 }
 0x4d9   : > { %v2829_v8 = vpop.f32.mrf.mxu3 }
 0x4da   : > { %v2871_v5 = vadd.f32 %v2829_v8, %v2692_v9  ;;  %v2656_v42 = vpop.f32.mrf.mxu1 }
 0x4db   : > { %v2694_v51 = vadd.f32 %v2656_v42, %v2515_v43 }
 0x4dc   : > { %v2923_v18 = vmul.f32 %v4676_v60, %v2871_v5 }
 0x4de   : > { %v2943_v39 = vadd.f32 %v4682_v50, %v2923_v18 }
 0x4e0   : > { %v2959_v16 = vmax.f32 %v2943_v39, 0.0 }
 0x4e1   : > { %v2832_v44 = vpop.f32.mrf.mxu3 }
 0x4e2   : > { %v3438_v31 = vpack.c.bf16 %v2959_v16, %v2958_v19  ;;  %v2872_v53 = vadd.f32 %v2832_v44, %v2693_v46  ;;  %v2659_v22 = vpop.f32.mrf.mxu1 }
 0x4e3   : > { %v2695_v47 = vadd.f32 %v2659_v22, %v2516_v59 }
 0x4e4   : > { %3454 = vst [vmem:[%s4692_s22 + $0x28] sm:$0xff] %v3438_v31   ;;  %v2924_v48 = vmul.f32 %v4676_v60, %v2872_v53 }
 0x4e6   : > { %v2944_v29 = vadd.f32 %v4682_v50, %v2924_v48 }
 0x4e8   : > { %v2960_v37 = vmax.f32 %v2944_v29, 0.0 }
 0x4e9   : > { %v2835_v14 = vpop.f32.mrf.mxu3 }
 0x4ea   : > { %v2873_v58 = vadd.f32 %v2835_v14, %v2694_v51  ;;  %v2662_v33 = vpop.f32.mrf.mxu1 }
 0x4eb   : > { %v2696_v3 = vadd.f32 %v2662_v33, %v2517_v54 }
 0x4ec   : > { %v2925_v49 = vmul.f32 %v4676_v60, %v2873_v58 }
 0x4ee   : > { %v2945_v23 = vadd.f32 %v4682_v50, %v2925_v49 }
 0x4f0   : > { %v2961_v62 = vmax.f32 %v2945_v23, 0.0 }
 0x4f1   : > { %v2838_v24 = vpop.f32.mrf.mxu3 }
 0x4f2   : > { %v3443_v63 = vpack.c.bf16 %v2961_v62, %v2960_v37  ;;  %v2874_v45 = vadd.f32 %v2838_v24, %v2695_v47 }
 0x4f4   : > { %3455 = vst [vmem:[%s4692_s22 + $0x30] sm:$0xff] %v3443_v63   ;;  %v2926_v4 = vmul.f32 %v4676_v60, %v2874_v45 }
 0x4f6   : > { %v2946_v26 = vadd.f32 %v4682_v50, %v2926_v4 }
 0x4f8   : > { %v2962_v11 = vmax.f32 %v2946_v26, 0.0 }
 0x4f9   : > { %v2841_v35 = vpop.f32.mrf.mxu3 }
 0x4fa   : > { %v2875_v61 = vadd.f32 %v2841_v35, %v2696_v3 }
 0x4fc   : > { %v2927_v10 = vmul.f32 %v4676_v60, %v2875_v61 }
 0x4fe   : > { %v2947_v57 = vadd.f32 %v4682_v50, %v2927_v10 }
 0x500   : > { %v2963_v13 = vmax.f32 %v2947_v57, 0.0 }
 0x502   : > { %v3448_v56 = vpack.c.bf16 %v2963_v13, %v2962_v11 }
 0x504   : > { %3456 = vst [vmem:[%s4692_s22 + $0x38] sm:$0xff] %v3448_v56  }
 0x505 PF: > { %s18_s27 = sadd.s32 1, %s3507_s27  }
 0x506   : > { %p15_p4 = scmp.ge.s32.totalorder %s18_s27, 4  }
 0x508   :  { %17 = sbr.rel (!%p15_p4) target bundleno = 1 (0x1), region = 91 }

</bundles_post_ra>
